<compile_context>
chip_gen: v7x
topology: tpu7x:2x2x1
jax: 0.10.0
libtpu: 0.0.40
codegen_flags: <defaults>
</compile_context>

<pallas_src>
import functools

import jax
import jax.numpy as jnp
from jax.experimental import pallas as pl
from jax.experimental.pallas import tpu as pltpu

LN_EPS = 1e-6
CFG = dict(img=32, patch=16, chans=3, dim=32, depth=2, heads=4,
           mlp_ratio=4, classes=10)
HEAD_PAD = 128  # lane-dense classifier output width (sliced to `classes`)


# ----------------------------- in-kernel helpers -----------------------------

def _layernorm(x, g, b):
    mean = jnp.mean(x, axis=-1, keepdims=True)
    var = jnp.mean((x - mean) ** 2, axis=-1, keepdims=True)
    return (x - mean) * jax.lax.rsqrt(var + LN_EPS) * g + b


def _gelu_exact(y):
    # exact (erf) GELU, matching torch.nn.GELU default
    return 0.5 * y * (1.0 + jax.lax.erf(y * jnp.float32(0.7071067811865476)))


# ----------------------------- fused Pallas kernel -----------------------------

def _deit_fused_kernel(patches_ref, patch_w_ref, patch_b_ref, cls_ref, pos_ref,
                       ln1_g_ref, ln1_b_ref, qkv_w_ref, qkv_b_ref,
                       proj_w_ref, proj_b_ref, ln2_g_ref, ln2_b_ref,
                       fc1_w_ref, fc1_b_ref, fc2_w_ref, fc2_b_ref,
                       lnf_g_ref, lnf_b_ref, head_w_ref, head_b_ref,
                       out_ref, *, depth, heads, scale):
    N, D = pos_ref.shape
    hd = D // heads

    # --- patch embed + cls token + pos embed ---
    # row 0 of the patches slab is a dummy zero row; it is replaced by the
    # cls token via a row-select (avoids an in-kernel concatenate).
    patches = patches_ref[0]                                     # (N, C*P*P)
    emb = jnp.dot(patches, patch_w_ref[...],
                  preferred_element_type=jnp.float32) + patch_b_ref[...]
    row = jax.lax.broadcasted_iota(jnp.int32, (N, D), 0)
    x = jnp.where(row == 0, cls_ref[...], emb) + pos_ref[...]    # (N, D)

    # --- transformer blocks (statically unrolled) ---
    for d in range(depth):
        # attention sub-block (pre-norm)
        h = _layernorm(x, ln1_g_ref[d], ln1_b_ref[d])
        qkv = jnp.dot(h, qkv_w_ref[d],
                      preferred_element_type=jnp.float32) + qkv_b_ref[d]
        q = qkv[:, 0:D] * jnp.float32(scale)
        k = qkv[:, D:2 * D]
        v = qkv[:, 2 * D:3 * D]
        proj_w = proj_w_ref[d]
        attn_proj = jnp.zeros((N, D), jnp.float32)
        for hh in range(heads):
            sl = slice(hh * hd, (hh + 1) * hd)
            # scores: contract last dims (no explicit k.T relayout)
            s = jax.lax.dot_general(q[:, sl], k[:, sl],
                                    (((1,), (1,)), ((), ())),
                                    preferred_element_type=jnp.float32)
            s = s - jnp.max(s, axis=-1, keepdims=True)
            p = jnp.exp(s)
            p = p * pl.reciprocal(jnp.sum(p, axis=-1, keepdims=True),
                                  approx=True)
            oh = jnp.dot(p, v[:, sl], preferred_element_type=jnp.float32)
            # fold head output straight into the output projection
            attn_proj = attn_proj + jnp.dot(
                oh, proj_w[sl, :], preferred_element_type=jnp.float32)
        x = x + attn_proj + proj_b_ref[d]

        # MLP sub-block (pre-norm), exact erf GELU
        h2 = _layernorm(x, ln2_g_ref[d], ln2_b_ref[d])
        h2 = jnp.dot(h2, fc1_w_ref[d],
                     preferred_element_type=jnp.float32) + fc1_b_ref[d]
        h2 = _gelu_exact(h2)
        h2 = jnp.dot(h2, fc2_w_ref[d],
                     preferred_element_type=jnp.float32) + fc2_b_ref[d]
        x = x + h2

    # --- final LN (cls token only) + classifier head (lane-dense 128 out) ---
    cls_n = _layernorm(x[0:1, :], lnf_g_ref[...], lnf_b_ref[...])
    logits = jnp.dot(cls_n, head_w_ref[...],
                     preferred_element_type=jnp.float32) + head_b_ref[...]
    out_ref[0] = logits


# ----------------------------- parameters -----------------------------

def init_params(key):
    C, P, D = CFG["chans"], CFG["patch"], CFG["dim"]
    depth, mlp, classes = CFG["depth"], CFG["mlp_ratio"], CFG["classes"]
    n_patches = (CFG["img"] // P) ** 2
    N = n_patches + 1            # +1 cls token (non-distilled DeiT)
    CPP = C * P * P

    def nrm(k, shape, std=0.02):
        return std * jax.random.normal(k, shape, dtype=jnp.float32)

    keys = jax.random.split(key, 4 + depth)
    qkv_w, proj_w, fc1_w, fc2_w = [], [], [], []
    for i in range(depth):
        bk = jax.random.split(keys[4 + i], 4)
        qkv_w.append(nrm(bk[0], (D, 3 * D)))
        proj_w.append(nrm(bk[1], (D, D)))
        fc1_w.append(nrm(bk[2], (D, mlp * D)))
        fc2_w.append(nrm(bk[3], (mlp * D, D)))

    # TODO(synk): pretrained torch.hub weight loading and freeze/unfreeze are
    # training-time bookkeeping with no forward-pass compute; omitted.
    return {
        "patch_w": nrm(keys[0], (CPP, D)),
        "patch_b": jnp.zeros((1, D), jnp.float32),
        "cls": nrm(keys[1], (1, D)),
        "pos": nrm(keys[2], (N, D)),
        "ln1_g": jnp.ones((depth, 1, D), jnp.float32),
        "ln1_b": jnp.zeros((depth, 1, D), jnp.float32),
        "qkv_w": jnp.stack(qkv_w),
        "qkv_b": jnp.zeros((depth, 1, 3 * D), jnp.float32),
        "proj_w": jnp.stack(proj_w),
        "proj_b": jnp.zeros((depth, 1, D), jnp.float32),
        "ln2_g": jnp.ones((depth, 1, D), jnp.float32),
        "ln2_b": jnp.zeros((depth, 1, D), jnp.float32),
        "fc1_w": jnp.stack(fc1_w),
        "fc1_b": jnp.zeros((depth, 1, mlp * D), jnp.float32),
        "fc2_w": jnp.stack(fc2_w),
        "fc2_b": jnp.zeros((depth, 1, D), jnp.float32),
        "lnf_g": jnp.ones((1, D), jnp.float32),
        "lnf_b": jnp.zeros((1, D), jnp.float32),
        "head_w": nrm(keys[3], (D, classes)),
        "head_b": jnp.zeros((classes,), jnp.float32),
    }


# ----------------------------- forward wrapper -----------------------------

def deit_forward(params, x):
    """x: NCHW float32 image batch (matching the PyTorch conv input)."""
    B, C, H, W = x.shape
    P, D = CFG["patch"], CFG["dim"]
    heads, depth, classes = CFG["heads"], CFG["depth"], CFG["classes"]
    hd = D // heads
    nph, npw = H // P, W // P
    n_patches = nph * npw
    N = n_patches + 1
    CPP = C * P * P

    # glue: NCHW -> (B, N, C*P*P) patch slab; row 0 is a dummy zero row that
    # the kernel overwrites with the cls token (stride==kernel conv == matmul).
    patches = (x.reshape(B, C, nph, P, npw, P)
                 .transpose(0, 2, 4, 1, 3, 5)
                 .reshape(B, n_patches, CPP))
    patches = jnp.concatenate(
        [jnp.zeros((B, 1, CPP), jnp.float32), patches], axis=1)

    # lane-dense classifier head: pad classes -> 128, slice after the kernel
    head_w = jnp.zeros((D, HEAD_PAD), jnp.float32).at[:, :classes].set(
        params["head_w"])
    head_b = jnp.zeros((1, HEAD_PAD), jnp.float32).at[0, :classes].set(
        params["head_b"])

    inputs = (patches, params["patch_w"], params["patch_b"], params["cls"],
              params["pos"],
              params["ln1_g"], params["ln1_b"], params["qkv_w"], params["qkv_b"],
              params["proj_w"], params["proj_b"], params["ln2_g"], params["ln2_b"],
              params["fc1_w"], params["fc1_b"], params["fc2_w"], params["fc2_b"],
              params["lnf_g"], params["lnf_b"], head_w, head_b)

    def _resident(a):
        # full array in VMEM; constant block index -> DMA'd once across grid
        return pl.BlockSpec(a.shape, lambda b, _nd=a.ndim: (0,) * _nd)

    in_specs = [pl.BlockSpec((1, N, CPP), lambda b: (b, 0, 0))]
    in_specs += [_resident(a) for a in inputs[1:]]

    kern = functools.partial(_deit_fused_kernel, depth=depth, heads=heads,
                             scale=float(hd) ** -0.5)

    out = pl.pallas_call(
        kern,
        grid=(B,),
        out_shape=jax.ShapeDtypeStruct((B, 1, HEAD_PAD), jnp.float32),
        in_specs=in_specs,
        out_specs=pl.BlockSpec((1, 1, HEAD_PAD), lambda b: (b, 0, 0)),
        compiler_params=pltpu.CompilerParams(
            dimension_semantics=("parallel",)),
    )(*inputs)
    return out[:, 0, :classes]


# ----------------------------- main -----------------------------

if __name__ == "__main__":
    key = jax.random.PRNGKey(0)
    kp, kx = jax.random.split(key)
    params = init_params(kp)
    # small DeiT-style input: batch=2, NCHW, 3x32x32 (patch 16 -> 4 patches)
    x = jax.random.normal(kx, (2, CFG["chans"], CFG["img"], CFG["img"]),
                          dtype=jnp.float32)

    logits = jax.jit(deit_forward)(params, x)
    jax.block_until_ready(logits)
    assert logits.shape == (2, CFG["classes"])
    print("KERNEL_OK")
</pallas_src>

<mosaic_0001>
module attributes {stable_mosaic.version = 11 : i64} {
  func.func @_deit_fused_kernel(%arg0: i32, %arg1: memref<1x5x768xf32, #tpu.memory_space<vmem>>, %arg2: memref<768x32xf32, #tpu.memory_space<vmem>>, %arg3: memref<1x32xf32, #tpu.memory_space<vmem>>, %arg4: memref<1x32xf32, #tpu.memory_space<vmem>>, %arg5: memref<5x32xf32, #tpu.memory_space<vmem>>, %arg6: memref<2x1x32xf32, #tpu.memory_space<vmem>>, %arg7: memref<2x1x32xf32, #tpu.memory_space<vmem>>, %arg8: memref<2x32x96xf32, #tpu.memory_space<vmem>>, %arg9: memref<2x1x96xf32, #tpu.memory_space<vmem>>, %arg10: memref<2x32x32xf32, #tpu.memory_space<vmem>>, %arg11: memref<2x1x32xf32, #tpu.memory_space<vmem>>, %arg12: memref<2x1x32xf32, #tpu.memory_space<vmem>>, %arg13: memref<2x1x32xf32, #tpu.memory_space<vmem>>, %arg14: memref<2x32x128xf32, #tpu.memory_space<vmem>>, %arg15: memref<2x1x128xf32, #tpu.memory_space<vmem>>, %arg16: memref<2x128x32xf32, #tpu.memory_space<vmem>>, %arg17: memref<2x1x32xf32, #tpu.memory_space<vmem>>, %arg18: memref<1x32xf32, #tpu.memory_space<vmem>>, %arg19: memref<1x32xf32, #tpu.memory_space<vmem>>, %arg20: memref<32x128xf32, #tpu.memory_space<vmem>>, %arg21: memref<1x128xf32, #tpu.memory_space<vmem>>, %arg22: memref<1x1x128xf32, #tpu.memory_space<vmem>>) attributes {dimension_semantics = [#tpu.dimension_semantics<parallel>], iteration_bounds = array<i64: 2>, scalar_prefetch = 0 : i64, scratch_operands = 0 : i64, tpu.core_type = #tpu.core_type<tc>, window_params = [{transform_indices = @transform_0, window_bounds = array<i64: 1, 5, 768>}, {pipeline_mode = #tpu.pipeline_mode<synchronous>, transform_indices = @transform_1, window_bounds = array<i64: 768, 32>}, {pipeline_mode = #tpu.pipeline_mode<synchronous>, transform_indices = @transform_2, window_bounds = array<i64: 1, 32>}, {pipeline_mode = #tpu.pipeline_mode<synchronous>, transform_indices = @transform_3, window_bounds = array<i64: 1, 32>}, {pipeline_mode = #tpu.pipeline_mode<synchronous>, transform_indices = @transform_4, window_bounds = array<i64: 5, 32>}, {pipeline_mode = #tpu.pipeline_mode<synchronous>, transform_indices = @transform_5, window_bounds = array<i64: 2, 1, 32>}, {pipeline_mode = #tpu.pipeline_mode<synchronous>, transform_indices = @transform_6, window_bounds = array<i64: 2, 1, 32>}, {pipeline_mode = #tpu.pipeline_mode<synchronous>, transform_indices = @transform_7, window_bounds = array<i64: 2, 32, 96>}, {pipeline_mode = #tpu.pipeline_mode<synchronous>, transform_indices = @transform_8, window_bounds = array<i64: 2, 1, 96>}, {pipeline_mode = #tpu.pipeline_mode<synchronous>, transform_indices = @transform_9, window_bounds = array<i64: 2, 32, 32>}, {pipeline_mode = #tpu.pipeline_mode<synchronous>, transform_indices = @transform_10, window_bounds = array<i64: 2, 1, 32>}, {pipeline_mode = #tpu.pipeline_mode<synchronous>, transform_indices = @transform_11, window_bounds = array<i64: 2, 1, 32>}, {pipeline_mode = #tpu.pipeline_mode<synchronous>, transform_indices = @transform_12, window_bounds = array<i64: 2, 1, 32>}, {pipeline_mode = #tpu.pipeline_mode<synchronous>, transform_indices = @transform_13, window_bounds = array<i64: 2, 32, 128>}, {pipeline_mode = #tpu.pipeline_mode<synchronous>, transform_indices = @transform_14, window_bounds = array<i64: 2, 1, 128>}, {pipeline_mode = #tpu.pipeline_mode<synchronous>, transform_indices = @transform_15, window_bounds = array<i64: 2, 128, 32>}, {pipeline_mode = #tpu.pipeline_mode<synchronous>, transform_indices = @transform_16, window_bounds = array<i64: 2, 1, 32>}, {pipeline_mode = #tpu.pipeline_mode<synchronous>, transform_indices = @transform_17, window_bounds = array<i64: 1, 32>}, {pipeline_mode = #tpu.pipeline_mode<synchronous>, transform_indices = @transform_18, window_bounds = array<i64: 1, 32>}, {pipeline_mode = #tpu.pipeline_mode<synchronous>, transform_indices = @transform_19, window_bounds = array<i64: 32, 128>}, {pipeline_mode = #tpu.pipeline_mode<synchronous>, transform_indices = @transform_20, window_bounds = array<i64: 1, 128>}, {transform_indices = @transform_21, window_bounds = array<i64: 1, 1, 128>}]} {
    %c0 = arith.constant 0 : index
    %c0_0 = arith.constant 0 : index
    %c0_1 = arith.constant 0 : index
    %0 = vector.load %arg1[%c0, %c0_0, %c0_1] : memref<1x5x768xf32, #tpu.memory_space<vmem>>, vector<1x5x768xf32>
    %1 = vector.shape_cast %0 : vector<1x5x768xf32> to vector<5x768xf32>
    %c0_2 = arith.constant 0 : index
    %c0_3 = arith.constant 0 : index
    %2 = vector.load %arg2[%c0_2, %c0_3] : memref<768x32xf32, #tpu.memory_space<vmem>>, vector<768x32xf32>
    %cst = arith.constant dense<0.000000e+00> : vector<5x32xf32>
    %3 = tpu.matmul %1, %2, %cst {dimension_numbers = #tpu.dot_dimension_numbers<[1], [0], [0], [1], [0, 0, 1, 1], [], []>} : vector<5x768xf32>, vector<768x32xf32>, vector<5x32xf32> -> vector<5x32xf32>
    %c0_4 = arith.constant 0 : index
    %c0_5 = arith.constant 0 : index
    %4 = vector.load %arg3[%c0_4, %c0_5] : memref<1x32xf32, #tpu.memory_space<vmem>>, vector<1x32xf32>
    %5 = vector.broadcast %4 : vector<1x32xf32> to vector<5x32xf32>
    %6 = arith.addf %3, %5 : vector<5x32xf32>
    %7 = tpu.iota {dimensions = array<i32: 0>} : vector<5x32xi32>
    %c0_i32 = arith.constant 0 : i32
    %8 = vector.broadcast %c0_i32 : i32 to vector<5x32xi32>
    %9 = arith.cmpi eq, %7, %8 : vector<5x32xi32>
    %c0_6 = arith.constant 0 : index
    %c0_7 = arith.constant 0 : index
    %10 = vector.load %arg4[%c0_6, %c0_7] : memref<1x32xf32, #tpu.memory_space<vmem>>, vector<1x32xf32>
    %11 = vector.shape_cast %10 : vector<1x32xf32> to vector<1x32xf32>
    %12 = vector.broadcast %11 : vector<1x32xf32> to vector<5x32xf32>
    %13 = arith.select %9, %12, %6 : vector<5x32xi1>, vector<5x32xf32>
    %c0_8 = arith.constant 0 : index
    %c0_9 = arith.constant 0 : index
    %14 = vector.load %arg5[%c0_8, %c0_9] : memref<5x32xf32, #tpu.memory_space<vmem>>, vector<5x32xf32>
    %15 = arith.addf %13, %14 : vector<5x32xf32>
    %c0_10 = arith.constant 0 : index
    %c0_11 = arith.constant 0 : index
    %c0_12 = arith.constant 0 : index
    %16 = vector.load %arg6[%c0_10, %c0_11, %c0_12] : memref<2x1x32xf32, #tpu.memory_space<vmem>>, vector<1x1x32xf32>
    %17 = vector.shape_cast %16 : vector<1x1x32xf32> to vector<1x32xf32>
    %c0_13 = arith.constant 0 : index
    %c0_14 = arith.constant 0 : index
    %c0_15 = arith.constant 0 : index
    %18 = vector.load %arg7[%c0_13, %c0_14, %c0_15] : memref<2x1x32xf32, #tpu.memory_space<vmem>>, vector<1x1x32xf32>
    %19 = vector.shape_cast %18 : vector<1x1x32xf32> to vector<1x32xf32>
    %cst_16 = arith.constant dense<0.000000e+00> : vector<5xf32>
    %20 = vector.multi_reduction <add>, %15, %cst_16 [1] : vector<5x32xf32> to vector<5xf32>
    %21 = vector.shape_cast %20 : vector<5xf32> to vector<5x1xf32>
    %cst_17 = arith.constant 3.200000e+01 : f32
    %22 = vector.broadcast %cst_17 : f32 to vector<5x1xf32>
    %23 = arith.divf %21, %22 : vector<5x1xf32>
    %24 = vector.broadcast %23 : vector<5x1xf32> to vector<5x32xf32>
    %25 = arith.subf %15, %24 : vector<5x32xf32>
    %26 = arith.mulf %25, %25 : vector<5x32xf32>
    %cst_18 = arith.constant dense<0.000000e+00> : vector<5xf32>
    %27 = vector.multi_reduction <add>, %26, %cst_18 [1] : vector<5x32xf32> to vector<5xf32>
    %28 = vector.shape_cast %27 : vector<5xf32> to vector<5x1xf32>
    %cst_19 = arith.constant 3.200000e+01 : f32
    %29 = vector.broadcast %cst_19 : f32 to vector<5x1xf32>
    %30 = arith.divf %28, %29 : vector<5x1xf32>
    %31 = vector.broadcast %23 : vector<5x1xf32> to vector<5x32xf32>
    %32 = arith.subf %15, %31 : vector<5x32xf32>
    %cst_20 = arith.constant 9.99999997E-7 : f32
    %33 = vector.broadcast %cst_20 : f32 to vector<5x1xf32>
    %34 = arith.addf %30, %33 : vector<5x1xf32>
    %35 = math.rsqrt %34 : vector<5x1xf32>
    %36 = vector.broadcast %35 : vector<5x1xf32> to vector<5x32xf32>
    %37 = arith.mulf %32, %36 : vector<5x32xf32>
    %38 = vector.broadcast %17 : vector<1x32xf32> to vector<5x32xf32>
    %39 = arith.mulf %37, %38 : vector<5x32xf32>
    %40 = vector.broadcast %19 : vector<1x32xf32> to vector<5x32xf32>
    %41 = arith.addf %39, %40 : vector<5x32xf32>
    %c0_21 = arith.constant 0 : index
    %c0_22 = arith.constant 0 : index
    %c0_23 = arith.constant 0 : index
    %42 = vector.load %arg8[%c0_21, %c0_22, %c0_23] : memref<2x32x96xf32, #tpu.memory_space<vmem>>, vector<1x32x96xf32>
    %43 = vector.shape_cast %42 : vector<1x32x96xf32> to vector<32x96xf32>
    %cst_24 = arith.constant dense<0.000000e+00> : vector<5x96xf32>
    %44 = tpu.matmul %41, %43, %cst_24 {dimension_numbers = #tpu.dot_dimension_numbers<[1], [0], [0], [1], [0, 0, 1, 1], [], []>} : vector<5x32xf32>, vector<32x96xf32>, vector<5x96xf32> -> vector<5x96xf32>
    %c0_25 = arith.constant 0 : index
    %c0_26 = arith.constant 0 : index
    %c0_27 = arith.constant 0 : index
    %45 = vector.load %arg9[%c0_25, %c0_26, %c0_27] : memref<2x1x96xf32, #tpu.memory_space<vmem>>, vector<1x1x96xf32>
    %46 = vector.shape_cast %45 : vector<1x1x96xf32> to vector<1x96xf32>
    %47 = vector.broadcast %46 : vector<1x96xf32> to vector<5x96xf32>
    %48 = arith.addf %44, %47 : vector<5x96xf32>
    %49 = vector.extract_strided_slice %48 {offsets = [0, 0], sizes = [5, 32], strides = [1, 1]} : vector<5x96xf32> to vector<5x32xf32>
    %cst_28 = arith.constant 0.353553385 : f32
    %50 = vector.broadcast %cst_28 : f32 to vector<5x32xf32>
    %51 = arith.mulf %49, %50 : vector<5x32xf32>
    %52 = vector.extract_strided_slice %48 {offsets = [0, 32], sizes = [5, 32], strides = [1, 1]} : vector<5x96xf32> to vector<5x32xf32>
    %53 = vector.extract_strided_slice %48 {offsets = [0, 64], sizes = [5, 32], strides = [1, 1]} : vector<5x96xf32> to vector<5x32xf32>
    %c0_29 = arith.constant 0 : index
    %c0_30 = arith.constant 0 : index
    %c0_31 = arith.constant 0 : index
    %54 = vector.load %arg10[%c0_29, %c0_30, %c0_31] : memref<2x32x32xf32, #tpu.memory_space<vmem>>, vector<1x32x32xf32>
    %55 = vector.shape_cast %54 : vector<1x32x32xf32> to vector<32x32xf32>
    %cst_32 = arith.constant 0.000000e+00 : f32
    %56 = vector.broadcast %cst_32 : f32 to vector<5x32xf32>
    %57 = vector.extract_strided_slice %51 {offsets = [0, 0], sizes = [5, 8], strides = [1, 1]} : vector<5x32xf32> to vector<5x8xf32>
    %58 = vector.extract_strided_slice %52 {offsets = [0, 0], sizes = [5, 8], strides = [1, 1]} : vector<5x32xf32> to vector<5x8xf32>
    %cst_33 = arith.constant dense<0.000000e+00> : vector<5x5xf32>
    %59 = tpu.matmul %57, %58, %cst_33 {dimension_numbers = #tpu.dot_dimension_numbers<[1], [1], [0], [0], [0, 0, 1, 0], [], []>} : vector<5x8xf32>, vector<5x8xf32>, vector<5x5xf32> -> vector<5x5xf32>
    %cst_34 = arith.constant dense<0xFF800000> : vector<5xf32>
    %60 = vector.multi_reduction <maximumf>, %59, %cst_34 [1] : vector<5x5xf32> to vector<5xf32>
    %61 = vector.shape_cast %60 : vector<5xf32> to vector<5x1xf32>
    %62 = vector.broadcast %61 : vector<5x1xf32> to vector<5x5xf32>
    %63 = arith.subf %59, %62 : vector<5x5xf32>
    %64 = math.exp %63 : vector<5x5xf32>
    %cst_35 = arith.constant dense<0.000000e+00> : vector<5xf32>
    %65 = vector.multi_reduction <add>, %64, %cst_35 [1] : vector<5x5xf32> to vector<5xf32>
    %66 = vector.shape_cast %65 : vector<5xf32> to vector<5x1xf32>
    %67 = tpu.reciprocal %66 {approx = true} : vector<5x1xf32> -> vector<5x1xf32>
    %68 = vector.broadcast %67 : vector<5x1xf32> to vector<5x5xf32>
    %69 = arith.mulf %64, %68 : vector<5x5xf32>
    %70 = vector.extract_strided_slice %53 {offsets = [0, 0], sizes = [5, 8], strides = [1, 1]} : vector<5x32xf32> to vector<5x8xf32>
    %cst_36 = arith.constant dense<0.000000e+00> : vector<5x8xf32>
    %71 = tpu.matmul %69, %70, %cst_36 {dimension_numbers = #tpu.dot_dimension_numbers<[1], [0], [0], [1], [0, 0, 1, 1], [], []>} : vector<5x5xf32>, vector<5x8xf32>, vector<5x8xf32> -> vector<5x8xf32>
    %72 = vector.extract_strided_slice %55 {offsets = [0, 0], sizes = [8, 32], strides = [1, 1]} : vector<32x32xf32> to vector<8x32xf32>
    %cst_37 = arith.constant dense<0.000000e+00> : vector<5x32xf32>
    %73 = tpu.matmul %71, %72, %cst_37 {dimension_numbers = #tpu.dot_dimension_numbers<[1], [0], [0], [1], [0, 0, 1, 1], [], []>} : vector<5x8xf32>, vector<8x32xf32>, vector<5x32xf32> -> vector<5x32xf32>
    %74 = arith.addf %56, %73 : vector<5x32xf32>
    %75 = vector.extract_strided_slice %51 {offsets = [0, 8], sizes = [5, 8], strides = [1, 1]} : vector<5x32xf32> to vector<5x8xf32>
    %76 = vector.extract_strided_slice %52 {offsets = [0, 8], sizes = [5, 8], strides = [1, 1]} : vector<5x32xf32> to vector<5x8xf32>
    %cst_38 = arith.constant dense<0.000000e+00> : vector<5x5xf32>
    %77 = tpu.matmul %75, %76, %cst_38 {dimension_numbers = #tpu.dot_dimension_numbers<[1], [1], [0], [0], [0, 0, 1, 0], [], []>} : vector<5x8xf32>, vector<5x8xf32>, vector<5x5xf32> -> vector<5x5xf32>
    %cst_39 = arith.constant dense<0xFF800000> : vector<5xf32>
    %78 = vector.multi_reduction <maximumf>, %77, %cst_39 [1] : vector<5x5xf32> to vector<5xf32>
    %79 = vector.shape_cast %78 : vector<5xf32> to vector<5x1xf32>
    %80 = vector.broadcast %79 : vector<5x1xf32> to vector<5x5xf32>
    %81 = arith.subf %77, %80 : vector<5x5xf32>
    %82 = math.exp %81 : vector<5x5xf32>
    %cst_40 = arith.constant dense<0.000000e+00> : vector<5xf32>
    %83 = vector.multi_reduction <add>, %82, %cst_40 [1] : vector<5x5xf32> to vector<5xf32>
    %84 = vector.shape_cast %83 : vector<5xf32> to vector<5x1xf32>
    %85 = tpu.reciprocal %84 {approx = true} : vector<5x1xf32> -> vector<5x1xf32>
    %86 = vector.broadcast %85 : vector<5x1xf32> to vector<5x5xf32>
    %87 = arith.mulf %82, %86 : vector<5x5xf32>
    %88 = vector.extract_strided_slice %53 {offsets = [0, 8], sizes = [5, 8], strides = [1, 1]} : vector<5x32xf32> to vector<5x8xf32>
    %cst_41 = arith.constant dense<0.000000e+00> : vector<5x8xf32>
    %89 = tpu.matmul %87, %88, %cst_41 {dimension_numbers = #tpu.dot_dimension_numbers<[1], [0], [0], [1], [0, 0, 1, 1], [], []>} : vector<5x5xf32>, vector<5x8xf32>, vector<5x8xf32> -> vector<5x8xf32>
    %90 = vector.extract_strided_slice %55 {offsets = [8, 0], sizes = [8, 32], strides = [1, 1]} : vector<32x32xf32> to vector<8x32xf32>
    %cst_42 = arith.constant dense<0.000000e+00> : vector<5x32xf32>
    %91 = tpu.matmul %89, %90, %cst_42 {dimension_numbers = #tpu.dot_dimension_numbers<[1], [0], [0], [1], [0, 0, 1, 1], [], []>} : vector<5x8xf32>, vector<8x32xf32>, vector<5x32xf32> -> vector<5x32xf32>
    %92 = arith.addf %74, %91 : vector<5x32xf32>
    %93 = vector.extract_strided_slice %51 {offsets = [0, 16], sizes = [5, 8], strides = [1, 1]} : vector<5x32xf32> to vector<5x8xf32>
    %94 = vector.extract_strided_slice %52 {offsets = [0, 16], sizes = [5, 8], strides = [1, 1]} : vector<5x32xf32> to vector<5x8xf32>
    %cst_43 = arith.constant dense<0.000000e+00> : vector<5x5xf32>
    %95 = tpu.matmul %93, %94, %cst_43 {dimension_numbers = #tpu.dot_dimension_numbers<[1], [1], [0], [0], [0, 0, 1, 0], [], []>} : vector<5x8xf32>, vector<5x8xf32>, vector<5x5xf32> -> vector<5x5xf32>
    %cst_44 = arith.constant dense<0xFF800000> : vector<5xf32>
    %96 = vector.multi_reduction <maximumf>, %95, %cst_44 [1] : vector<5x5xf32> to vector<5xf32>
    %97 = vector.shape_cast %96 : vector<5xf32> to vector<5x1xf32>
    %98 = vector.broadcast %97 : vector<5x1xf32> to vector<5x5xf32>
    %99 = arith.subf %95, %98 : vector<5x5xf32>
    %100 = math.exp %99 : vector<5x5xf32>
    %cst_45 = arith.constant dense<0.000000e+00> : vector<5xf32>
    %101 = vector.multi_reduction <add>, %100, %cst_45 [1] : vector<5x5xf32> to vector<5xf32>
    %102 = vector.shape_cast %101 : vector<5xf32> to vector<5x1xf32>
    %103 = tpu.reciprocal %102 {approx = true} : vector<5x1xf32> -> vector<5x1xf32>
    %104 = vector.broadcast %103 : vector<5x1xf32> to vector<5x5xf32>
    %105 = arith.mulf %100, %104 : vector<5x5xf32>
    %106 = vector.extract_strided_slice %53 {offsets = [0, 16], sizes = [5, 8], strides = [1, 1]} : vector<5x32xf32> to vector<5x8xf32>
    %cst_46 = arith.constant dense<0.000000e+00> : vector<5x8xf32>
    %107 = tpu.matmul %105, %106, %cst_46 {dimension_numbers = #tpu.dot_dimension_numbers<[1], [0], [0], [1], [0, 0, 1, 1], [], []>} : vector<5x5xf32>, vector<5x8xf32>, vector<5x8xf32> -> vector<5x8xf32>
    %108 = vector.extract_strided_slice %55 {offsets = [16, 0], sizes = [8, 32], strides = [1, 1]} : vector<32x32xf32> to vector<8x32xf32>
    %cst_47 = arith.constant dense<0.000000e+00> : vector<5x32xf32>
    %109 = tpu.matmul %107, %108, %cst_47 {dimension_numbers = #tpu.dot_dimension_numbers<[1], [0], [0], [1], [0, 0, 1, 1], [], []>} : vector<5x8xf32>, vector<8x32xf32>, vector<5x32xf32> -> vector<5x32xf32>
    %110 = arith.addf %92, %109 : vector<5x32xf32>
    %111 = vector.extract_strided_slice %51 {offsets = [0, 24], sizes = [5, 8], strides = [1, 1]} : vector<5x32xf32> to vector<5x8xf32>
    %112 = vector.extract_strided_slice %52 {offsets = [0, 24], sizes = [5, 8], strides = [1, 1]} : vector<5x32xf32> to vector<5x8xf32>
    %cst_48 = arith.constant dense<0.000000e+00> : vector<5x5xf32>
    %113 = tpu.matmul %111, %112, %cst_48 {dimension_numbers = #tpu.dot_dimension_numbers<[1], [1], [0], [0], [0, 0, 1, 0], [], []>} : vector<5x8xf32>, vector<5x8xf32>, vector<5x5xf32> -> vector<5x5xf32>
    %cst_49 = arith.constant dense<0xFF800000> : vector<5xf32>
    %114 = vector.multi_reduction <maximumf>, %113, %cst_49 [1] : vector<5x5xf32> to vector<5xf32>
    %115 = vector.shape_cast %114 : vector<5xf32> to vector<5x1xf32>
    %116 = vector.broadcast %115 : vector<5x1xf32> to vector<5x5xf32>
    %117 = arith.subf %113, %116 : vector<5x5xf32>
    %118 = math.exp %117 : vector<5x5xf32>
    %cst_50 = arith.constant dense<0.000000e+00> : vector<5xf32>
    %119 = vector.multi_reduction <add>, %118, %cst_50 [1] : vector<5x5xf32> to vector<5xf32>
    %120 = vector.shape_cast %119 : vector<5xf32> to vector<5x1xf32>
    %121 = tpu.reciprocal %120 {approx = true} : vector<5x1xf32> -> vector<5x1xf32>
    %122 = vector.broadcast %121 : vector<5x1xf32> to vector<5x5xf32>
    %123 = arith.mulf %118, %122 : vector<5x5xf32>
    %124 = vector.extract_strided_slice %53 {offsets = [0, 24], sizes = [5, 8], strides = [1, 1]} : vector<5x32xf32> to vector<5x8xf32>
    %cst_51 = arith.constant dense<0.000000e+00> : vector<5x8xf32>
    %125 = tpu.matmul %123, %124, %cst_51 {dimension_numbers = #tpu.dot_dimension_numbers<[1], [0], [0], [1], [0, 0, 1, 1], [], []>} : vector<5x5xf32>, vector<5x8xf32>, vector<5x8xf32> -> vector<5x8xf32>
    %126 = vector.extract_strided_slice %55 {offsets = [24, 0], sizes = [8, 32], strides = [1, 1]} : vector<32x32xf32> to vector<8x32xf32>
    %cst_52 = arith.constant dense<0.000000e+00> : vector<5x32xf32>
    %127 = tpu.matmul %125, %126, %cst_52 {dimension_numbers = #tpu.dot_dimension_numbers<[1], [0], [0], [1], [0, 0, 1, 1], [], []>} : vector<5x8xf32>, vector<8x32xf32>, vector<5x32xf32> -> vector<5x32xf32>
    %128 = arith.addf %110, %127 : vector<5x32xf32>
    %129 = arith.addf %15, %128 : vector<5x32xf32>
    %c0_53 = arith.constant 0 : index
    %c0_54 = arith.constant 0 : index
    %c0_55 = arith.constant 0 : index
    %130 = vector.load %arg11[%c0_53, %c0_54, %c0_55] : memref<2x1x32xf32, #tpu.memory_space<vmem>>, vector<1x1x32xf32>
    %131 = vector.shape_cast %130 : vector<1x1x32xf32> to vector<1x32xf32>
    %132 = vector.broadcast %131 : vector<1x32xf32> to vector<5x32xf32>
    %133 = arith.addf %129, %132 : vector<5x32xf32>
    %c0_56 = arith.constant 0 : index
    %c0_57 = arith.constant 0 : index
    %c0_58 = arith.constant 0 : index
    %134 = vector.load %arg12[%c0_56, %c0_57, %c0_58] : memref<2x1x32xf32, #tpu.memory_space<vmem>>, vector<1x1x32xf32>
    %135 = vector.shape_cast %134 : vector<1x1x32xf32> to vector<1x32xf32>
    %c0_59 = arith.constant 0 : index
    %c0_60 = arith.constant 0 : index
    %c0_61 = arith.constant 0 : index
    %136 = vector.load %arg13[%c0_59, %c0_60, %c0_61] : memref<2x1x32xf32, #tpu.memory_space<vmem>>, vector<1x1x32xf32>
    %137 = vector.shape_cast %136 : vector<1x1x32xf32> to vector<1x32xf32>
    %cst_62 = arith.constant dense<0.000000e+00> : vector<5xf32>
    %138 = vector.multi_reduction <add>, %133, %cst_62 [1] : vector<5x32xf32> to vector<5xf32>
    %139 = vector.shape_cast %138 : vector<5xf32> to vector<5x1xf32>
    %cst_63 = arith.constant 3.200000e+01 : f32
    %140 = vector.broadcast %cst_63 : f32 to vector<5x1xf32>
    %141 = arith.divf %139, %140 : vector<5x1xf32>
    %142 = vector.broadcast %141 : vector<5x1xf32> to vector<5x32xf32>
    %143 = arith.subf %133, %142 : vector<5x32xf32>
    %144 = arith.mulf %143, %143 : vector<5x32xf32>
    %cst_64 = arith.constant dense<0.000000e+00> : vector<5xf32>
    %145 = vector.multi_reduction <add>, %144, %cst_64 [1] : vector<5x32xf32> to vector<5xf32>
    %146 = vector.shape_cast %145 : vector<5xf32> to vector<5x1xf32>
    %cst_65 = arith.constant 3.200000e+01 : f32
    %147 = vector.broadcast %cst_65 : f32 to vector<5x1xf32>
    %148 = arith.divf %146, %147 : vector<5x1xf32>
    %149 = vector.broadcast %141 : vector<5x1xf32> to vector<5x32xf32>
    %150 = arith.subf %133, %149 : vector<5x32xf32>
    %cst_66 = arith.constant 9.99999997E-7 : f32
    %151 = vector.broadcast %cst_66 : f32 to vector<5x1xf32>
    %152 = arith.addf %148, %151 : vector<5x1xf32>
    %153 = math.rsqrt %152 : vector<5x1xf32>
    %154 = vector.broadcast %153 : vector<5x1xf32> to vector<5x32xf32>
    %155 = arith.mulf %150, %154 : vector<5x32xf32>
    %156 = vector.broadcast %135 : vector<1x32xf32> to vector<5x32xf32>
    %157 = arith.mulf %155, %156 : vector<5x32xf32>
    %158 = vector.broadcast %137 : vector<1x32xf32> to vector<5x32xf32>
    %159 = arith.addf %157, %158 : vector<5x32xf32>
    %c0_67 = arith.constant 0 : index
    %c0_68 = arith.constant 0 : index
    %c0_69 = arith.constant 0 : index
    %160 = vector.load %arg14[%c0_67, %c0_68, %c0_69] : memref<2x32x128xf32, #tpu.memory_space<vmem>>, vector<1x32x128xf32>
    %161 = vector.shape_cast %160 : vector<1x32x128xf32> to vector<32x128xf32>
    %cst_70 = arith.constant dense<0.000000e+00> : vector<5x128xf32>
    %162 = tpu.matmul %159, %161, %cst_70 {dimension_numbers = #tpu.dot_dimension_numbers<[1], [0], [0], [1], [0, 0, 1, 1], [], []>} : vector<5x32xf32>, vector<32x128xf32>, vector<5x128xf32> -> vector<5x128xf32>
    %c0_71 = arith.constant 0 : index
    %c0_72 = arith.constant 0 : index
    %c0_73 = arith.constant 0 : index
    %163 = vector.load %arg15[%c0_71, %c0_72, %c0_73] : memref<2x1x128xf32, #tpu.memory_space<vmem>>, vector<1x1x128xf32>
    %164 = vector.shape_cast %163 : vector<1x1x128xf32> to vector<1x128xf32>
    %165 = vector.broadcast %164 : vector<1x128xf32> to vector<5x128xf32>
    %166 = arith.addf %162, %165 : vector<5x128xf32>
    %cst_74 = arith.constant 5.000000e-01 : f32
    %167 = vector.broadcast %cst_74 : f32 to vector<5x128xf32>
    %168 = arith.mulf %167, %166 : vector<5x128xf32>
    %cst_75 = arith.constant 0.707106769 : f32
    %169 = vector.broadcast %cst_75 : f32 to vector<5x128xf32>
    %170 = arith.mulf %166, %169 : vector<5x128xf32>
    %171 = math.erf %170 : vector<5x128xf32>
    %cst_76 = arith.constant 1.000000e+00 : f32
    %172 = vector.broadcast %cst_76 : f32 to vector<5x128xf32>
    %173 = arith.addf %172, %171 : vector<5x128xf32>
    %174 = arith.mulf %168, %173 : vector<5x128xf32>
    %c0_77 = arith.constant 0 : index
    %c0_78 = arith.constant 0 : index
    %c0_79 = arith.constant 0 : index
    %175 = vector.load %arg16[%c0_77, %c0_78, %c0_79] : memref<2x128x32xf32, #tpu.memory_space<vmem>>, vector<1x128x32xf32>
    %176 = vector.shape_cast %175 : vector<1x128x32xf32> to vector<128x32xf32>
    %cst_80 = arith.constant dense<0.000000e+00> : vector<5x32xf32>
    %177 = tpu.matmul %174, %176, %cst_80 {dimension_numbers = #tpu.dot_dimension_numbers<[1], [0], [0], [1], [0, 0, 1, 1], [], []>} : vector<5x128xf32>, vector<128x32xf32>, vector<5x32xf32> -> vector<5x32xf32>
    %c0_81 = arith.constant 0 : index
    %c0_82 = arith.constant 0 : index
    %c0_83 = arith.constant 0 : index
    %178 = vector.load %arg17[%c0_81, %c0_82, %c0_83] : memref<2x1x32xf32, #tpu.memory_space<vmem>>, vector<1x1x32xf32>
    %179 = vector.shape_cast %178 : vector<1x1x32xf32> to vector<1x32xf32>
    %180 = vector.broadcast %179 : vector<1x32xf32> to vector<5x32xf32>
    %181 = arith.addf %177, %180 : vector<5x32xf32>
    %182 = arith.addf %133, %181 : vector<5x32xf32>
    %c1 = arith.constant 1 : index
    %c0_84 = arith.constant 0 : index
    %c0_85 = arith.constant 0 : index
    %183 = vector.load %arg6[%c1, %c0_84, %c0_85] : memref<2x1x32xf32, #tpu.memory_space<vmem>>, vector<1x1x32xf32>
    %184 = vector.shape_cast %183 : vector<1x1x32xf32> to vector<1x32xf32>
    %c1_86 = arith.constant 1 : index
    %c0_87 = arith.constant 0 : index
    %c0_88 = arith.constant 0 : index
    %185 = vector.load %arg7[%c1_86, %c0_87, %c0_88] : memref<2x1x32xf32, #tpu.memory_space<vmem>>, vector<1x1x32xf32>
    %186 = vector.shape_cast %185 : vector<1x1x32xf32> to vector<1x32xf32>
    %cst_89 = arith.constant dense<0.000000e+00> : vector<5xf32>
    %187 = vector.multi_reduction <add>, %182, %cst_89 [1] : vector<5x32xf32> to vector<5xf32>
    %188 = vector.shape_cast %187 : vector<5xf32> to vector<5x1xf32>
    %cst_90 = arith.constant 3.200000e+01 : f32
    %189 = vector.broadcast %cst_90 : f32 to vector<5x1xf32>
    %190 = arith.divf %188, %189 : vector<5x1xf32>
    %191 = vector.broadcast %190 : vector<5x1xf32> to vector<5x32xf32>
    %192 = arith.subf %182, %191 : vector<5x32xf32>
    %193 = arith.mulf %192, %192 : vector<5x32xf32>
    %cst_91 = arith.constant dense<0.000000e+00> : vector<5xf32>
    %194 = vector.multi_reduction <add>, %193, %cst_91 [1] : vector<5x32xf32> to vector<5xf32>
    %195 = vector.shape_cast %194 : vector<5xf32> to vector<5x1xf32>
    %cst_92 = arith.constant 3.200000e+01 : f32
    %196 = vector.broadcast %cst_92 : f32 to vector<5x1xf32>
    %197 = arith.divf %195, %196 : vector<5x1xf32>
    %198 = vector.broadcast %190 : vector<5x1xf32> to vector<5x32xf32>
    %199 = arith.subf %182, %198 : vector<5x32xf32>
    %cst_93 = arith.constant 9.99999997E-7 : f32
    %200 = vector.broadcast %cst_93 : f32 to vector<5x1xf32>
    %201 = arith.addf %197, %200 : vector<5x1xf32>
    %202 = math.rsqrt %201 : vector<5x1xf32>
    %203 = vector.broadcast %202 : vector<5x1xf32> to vector<5x32xf32>
    %204 = arith.mulf %199, %203 : vector<5x32xf32>
    %205 = vector.broadcast %184 : vector<1x32xf32> to vector<5x32xf32>
    %206 = arith.mulf %204, %205 : vector<5x32xf32>
    %207 = vector.broadcast %186 : vector<1x32xf32> to vector<5x32xf32>
    %208 = arith.addf %206, %207 : vector<5x32xf32>
    %c1_94 = arith.constant 1 : index
    %c0_95 = arith.constant 0 : index
    %c0_96 = arith.constant 0 : index
    %209 = vector.load %arg8[%c1_94, %c0_95, %c0_96] : memref<2x32x96xf32, #tpu.memory_space<vmem>>, vector<1x32x96xf32>
    %210 = vector.shape_cast %209 : vector<1x32x96xf32> to vector<32x96xf32>
    %cst_97 = arith.constant dense<0.000000e+00> : vector<5x96xf32>
    %211 = tpu.matmul %208, %210, %cst_97 {dimension_numbers = #tpu.dot_dimension_numbers<[1], [0], [0], [1], [0, 0, 1, 1], [], []>} : vector<5x32xf32>, vector<32x96xf32>, vector<5x96xf32> -> vector<5x96xf32>
    %c1_98 = arith.constant 1 : index
    %c0_99 = arith.constant 0 : index
    %c0_100 = arith.constant 0 : index
    %212 = vector.load %arg9[%c1_98, %c0_99, %c0_100] : memref<2x1x96xf32, #tpu.memory_space<vmem>>, vector<1x1x96xf32>
    %213 = vector.shape_cast %212 : vector<1x1x96xf32> to vector<1x96xf32>
    %214 = vector.broadcast %213 : vector<1x96xf32> to vector<5x96xf32>
    %215 = arith.addf %211, %214 : vector<5x96xf32>
    %216 = vector.extract_strided_slice %215 {offsets = [0, 0], sizes = [5, 32], strides = [1, 1]} : vector<5x96xf32> to vector<5x32xf32>
    %cst_101 = arith.constant 0.353553385 : f32
    %217 = vector.broadcast %cst_101 : f32 to vector<5x32xf32>
    %218 = arith.mulf %216, %217 : vector<5x32xf32>
    %219 = vector.extract_strided_slice %215 {offsets = [0, 32], sizes = [5, 32], strides = [1, 1]} : vector<5x96xf32> to vector<5x32xf32>
    %220 = vector.extract_strided_slice %215 {offsets = [0, 64], sizes = [5, 32], strides = [1, 1]} : vector<5x96xf32> to vector<5x32xf32>
    %c1_102 = arith.constant 1 : index
    %c0_103 = arith.constant 0 : index
    %c0_104 = arith.constant 0 : index
    %221 = vector.load %arg10[%c1_102, %c0_103, %c0_104] : memref<2x32x32xf32, #tpu.memory_space<vmem>>, vector<1x32x32xf32>
    %222 = vector.shape_cast %221 : vector<1x32x32xf32> to vector<32x32xf32>
    %cst_105 = arith.constant 0.000000e+00 : f32
    %223 = vector.broadcast %cst_105 : f32 to vector<5x32xf32>
    %224 = vector.extract_strided_slice %218 {offsets = [0, 0], sizes = [5, 8], strides = [1, 1]} : vector<5x32xf32> to vector<5x8xf32>
    %225 = vector.extract_strided_slice %219 {offsets = [0, 0], sizes = [5, 8], strides = [1, 1]} : vector<5x32xf32> to vector<5x8xf32>
    %cst_106 = arith.constant dense<0.000000e+00> : vector<5x5xf32>
    %226 = tpu.matmul %224, %225, %cst_106 {dimension_numbers = #tpu.dot_dimension_numbers<[1], [1], [0], [0], [0, 0, 1, 0], [], []>} : vector<5x8xf32>, vector<5x8xf32>, vector<5x5xf32> -> vector<5x5xf32>
    %cst_107 = arith.constant dense<0xFF800000> : vector<5xf32>
    %227 = vector.multi_reduction <maximumf>, %226, %cst_107 [1] : vector<5x5xf32> to vector<5xf32>
    %228 = vector.shape_cast %227 : vector<5xf32> to vector<5x1xf32>
    %229 = vector.broadcast %228 : vector<5x1xf32> to vector<5x5xf32>
    %230 = arith.subf %226, %229 : vector<5x5xf32>
    %231 = math.exp %230 : vector<5x5xf32>
    %cst_108 = arith.constant dense<0.000000e+00> : vector<5xf32>
    %232 = vector.multi_reduction <add>, %231, %cst_108 [1] : vector<5x5xf32> to vector<5xf32>
    %233 = vector.shape_cast %232 : vector<5xf32> to vector<5x1xf32>
    %234 = tpu.reciprocal %233 {approx = true} : vector<5x1xf32> -> vector<5x1xf32>
    %235 = vector.broadcast %234 : vector<5x1xf32> to vector<5x5xf32>
    %236 = arith.mulf %231, %235 : vector<5x5xf32>
    %237 = vector.extract_strided_slice %220 {offsets = [0, 0], sizes = [5, 8], strides = [1, 1]} : vector<5x32xf32> to vector<5x8xf32>
    %cst_109 = arith.constant dense<0.000000e+00> : vector<5x8xf32>
    %238 = tpu.matmul %236, %237, %cst_109 {dimension_numbers = #tpu.dot_dimension_numbers<[1], [0], [0], [1], [0, 0, 1, 1], [], []>} : vector<5x5xf32>, vector<5x8xf32>, vector<5x8xf32> -> vector<5x8xf32>
    %239 = vector.extract_strided_slice %222 {offsets = [0, 0], sizes = [8, 32], strides = [1, 1]} : vector<32x32xf32> to vector<8x32xf32>
    %cst_110 = arith.constant dense<0.000000e+00> : vector<5x32xf32>
    %240 = tpu.matmul %238, %239, %cst_110 {dimension_numbers = #tpu.dot_dimension_numbers<[1], [0], [0], [1], [0, 0, 1, 1], [], []>} : vector<5x8xf32>, vector<8x32xf32>, vector<5x32xf32> -> vector<5x32xf32>
    %241 = arith.addf %223, %240 : vector<5x32xf32>
    %242 = vector.extract_strided_slice %218 {offsets = [0, 8], sizes = [5, 8], strides = [1, 1]} : vector<5x32xf32> to vector<5x8xf32>
    %243 = vector.extract_strided_slice %219 {offsets = [0, 8], sizes = [5, 8], strides = [1, 1]} : vector<5x32xf32> to vector<5x8xf32>
    %cst_111 = arith.constant dense<0.000000e+00> : vector<5x5xf32>
    %244 = tpu.matmul %242, %243, %cst_111 {dimension_numbers = #tpu.dot_dimension_numbers<[1], [1], [0], [0], [0, 0, 1, 0], [], []>} : vector<5x8xf32>, vector<5x8xf32>, vector<5x5xf32> -> vector<5x5xf32>
    %cst_112 = arith.constant dense<0xFF800000> : vector<5xf32>
    %245 = vector.multi_reduction <maximumf>, %244, %cst_112 [1] : vector<5x5xf32> to vector<5xf32>
    %246 = vector.shape_cast %245 : vector<5xf32> to vector<5x1xf32>
    %247 = vector.broadcast %246 : vector<5x1xf32> to vector<5x5xf32>
    %248 = arith.subf %244, %247 : vector<5x5xf32>
    %249 = math.exp %248 : vector<5x5xf32>
    %cst_113 = arith.constant dense<0.000000e+00> : vector<5xf32>
    %250 = vector.multi_reduction <add>, %249, %cst_113 [1] : vector<5x5xf32> to vector<5xf32>
    %251 = vector.shape_cast %250 : vector<5xf32> to vector<5x1xf32>
    %252 = tpu.reciprocal %251 {approx = true} : vector<5x1xf32> -> vector<5x1xf32>
    %253 = vector.broadcast %252 : vector<5x1xf32> to vector<5x5xf32>
    %254 = arith.mulf %249, %253 : vector<5x5xf32>
    %255 = vector.extract_strided_slice %220 {offsets = [0, 8], sizes = [5, 8], strides = [1, 1]} : vector<5x32xf32> to vector<5x8xf32>
    %cst_114 = arith.constant dense<0.000000e+00> : vector<5x8xf32>
    %256 = tpu.matmul %254, %255, %cst_114 {dimension_numbers = #tpu.dot_dimension_numbers<[1], [0], [0], [1], [0, 0, 1, 1], [], []>} : vector<5x5xf32>, vector<5x8xf32>, vector<5x8xf32> -> vector<5x8xf32>
    %257 = vector.extract_strided_slice %222 {offsets = [8, 0], sizes = [8, 32], strides = [1, 1]} : vector<32x32xf32> to vector<8x32xf32>
    %cst_115 = arith.constant dense<0.000000e+00> : vector<5x32xf32>
    %258 = tpu.matmul %256, %257, %cst_115 {dimension_numbers = #tpu.dot_dimension_numbers<[1], [0], [0], [1], [0, 0, 1, 1], [], []>} : vector<5x8xf32>, vector<8x32xf32>, vector<5x32xf32> -> vector<5x32xf32>
    %259 = arith.addf %241, %258 : vector<5x32xf32>
    %260 = vector.extract_strided_slice %218 {offsets = [0, 16], sizes = [5, 8], strides = [1, 1]} : vector<5x32xf32> to vector<5x8xf32>
    %261 = vector.extract_strided_slice %219 {offsets = [0, 16], sizes = [5, 8], strides = [1, 1]} : vector<5x32xf32> to vector<5x8xf32>
    %cst_116 = arith.constant dense<0.000000e+00> : vector<5x5xf32>
    %262 = tpu.matmul %260, %261, %cst_116 {dimension_numbers = #tpu.dot_dimension_numbers<[1], [1], [0], [0], [0, 0, 1, 0], [], []>} : vector<5x8xf32>, vector<5x8xf32>, vector<5x5xf32> -> vector<5x5xf32>
    %cst_117 = arith.constant dense<0xFF800000> : vector<5xf32>
    %263 = vector.multi_reduction <maximumf>, %262, %cst_117 [1] : vector<5x5xf32> to vector<5xf32>
    %264 = vector.shape_cast %263 : vector<5xf32> to vector<5x1xf32>
    %265 = vector.broadcast %264 : vector<5x1xf32> to vector<5x5xf32>
    %266 = arith.subf %262, %265 : vector<5x5xf32>
    %267 = math.exp %266 : vector<5x5xf32>
    %cst_118 = arith.constant dense<0.000000e+00> : vector<5xf32>
    %268 = vector.multi_reduction <add>, %267, %cst_118 [1] : vector<5x5xf32> to vector<5xf32>
    %269 = vector.shape_cast %268 : vector<5xf32> to vector<5x1xf32>
    %270 = tpu.reciprocal %269 {approx = true} : vector<5x1xf32> -> vector<5x1xf32>
    %271 = vector.broadcast %270 : vector<5x1xf32> to vector<5x5xf32>
    %272 = arith.mulf %267, %271 : vector<5x5xf32>
    %273 = vector.extract_strided_slice %220 {offsets = [0, 16], sizes = [5, 8], strides = [1, 1]} : vector<5x32xf32> to vector<5x8xf32>
    %cst_119 = arith.constant dense<0.000000e+00> : vector<5x8xf32>
    %274 = tpu.matmul %272, %273, %cst_119 {dimension_numbers = #tpu.dot_dimension_numbers<[1], [0], [0], [1], [0, 0, 1, 1], [], []>} : vector<5x5xf32>, vector<5x8xf32>, vector<5x8xf32> -> vector<5x8xf32>
    %275 = vector.extract_strided_slice %222 {offsets = [16, 0], sizes = [8, 32], strides = [1, 1]} : vector<32x32xf32> to vector<8x32xf32>
    %cst_120 = arith.constant dense<0.000000e+00> : vector<5x32xf32>
    %276 = tpu.matmul %274, %275, %cst_120 {dimension_numbers = #tpu.dot_dimension_numbers<[1], [0], [0], [1], [0, 0, 1, 1], [], []>} : vector<5x8xf32>, vector<8x32xf32>, vector<5x32xf32> -> vector<5x32xf32>
    %277 = arith.addf %259, %276 : vector<5x32xf32>
    %278 = vector.extract_strided_slice %218 {offsets = [0, 24], sizes = [5, 8], strides = [1, 1]} : vector<5x32xf32> to vector<5x8xf32>
    %279 = vector.extract_strided_slice %219 {offsets = [0, 24], sizes = [5, 8], strides = [1, 1]} : vector<5x32xf32> to vector<5x8xf32>
    %cst_121 = arith.constant dense<0.000000e+00> : vector<5x5xf32>
    %280 = tpu.matmul %278, %279, %cst_121 {dimension_numbers = #tpu.dot_dimension_numbers<[1], [1], [0], [0], [0, 0, 1, 0], [], []>} : vector<5x8xf32>, vector<5x8xf32>, vector<5x5xf32> -> vector<5x5xf32>
    %cst_122 = arith.constant dense<0xFF800000> : vector<5xf32>
    %281 = vector.multi_reduction <maximumf>, %280, %cst_122 [1] : vector<5x5xf32> to vector<5xf32>
    %282 = vector.shape_cast %281 : vector<5xf32> to vector<5x1xf32>
    %283 = vector.broadcast %282 : vector<5x1xf32> to vector<5x5xf32>
    %284 = arith.subf %280, %283 : vector<5x5xf32>
    %285 = math.exp %284 : vector<5x5xf32>
    %cst_123 = arith.constant dense<0.000000e+00> : vector<5xf32>
    %286 = vector.multi_reduction <add>, %285, %cst_123 [1] : vector<5x5xf32> to vector<5xf32>
    %287 = vector.shape_cast %286 : vector<5xf32> to vector<5x1xf32>
    %288 = tpu.reciprocal %287 {approx = true} : vector<5x1xf32> -> vector<5x1xf32>
    %289 = vector.broadcast %288 : vector<5x1xf32> to vector<5x5xf32>
    %290 = arith.mulf %285, %289 : vector<5x5xf32>
    %291 = vector.extract_strided_slice %220 {offsets = [0, 24], sizes = [5, 8], strides = [1, 1]} : vector<5x32xf32> to vector<5x8xf32>
    %cst_124 = arith.constant dense<0.000000e+00> : vector<5x8xf32>
    %292 = tpu.matmul %290, %291, %cst_124 {dimension_numbers = #tpu.dot_dimension_numbers<[1], [0], [0], [1], [0, 0, 1, 1], [], []>} : vector<5x5xf32>, vector<5x8xf32>, vector<5x8xf32> -> vector<5x8xf32>
    %293 = vector.extract_strided_slice %222 {offsets = [24, 0], sizes = [8, 32], strides = [1, 1]} : vector<32x32xf32> to vector<8x32xf32>
    %cst_125 = arith.constant dense<0.000000e+00> : vector<5x32xf32>
    %294 = tpu.matmul %292, %293, %cst_125 {dimension_numbers = #tpu.dot_dimension_numbers<[1], [0], [0], [1], [0, 0, 1, 1], [], []>} : vector<5x8xf32>, vector<8x32xf32>, vector<5x32xf32> -> vector<5x32xf32>
    %295 = arith.addf %277, %294 : vector<5x32xf32>
    %296 = arith.addf %182, %295 : vector<5x32xf32>
    %c1_126 = arith.constant 1 : index
    %c0_127 = arith.constant 0 : index
    %c0_128 = arith.constant 0 : index
    %297 = vector.load %arg11[%c1_126, %c0_127, %c0_128] : memref<2x1x32xf32, #tpu.memory_space<vmem>>, vector<1x1x32xf32>
    %298 = vector.shape_cast %297 : vector<1x1x32xf32> to vector<1x32xf32>
    %299 = vector.broadcast %298 : vector<1x32xf32> to vector<5x32xf32>
    %300 = arith.addf %296, %299 : vector<5x32xf32>
    %c1_129 = arith.constant 1 : index
    %c0_130 = arith.constant 0 : index
    %c0_131 = arith.constant 0 : index
    %301 = vector.load %arg12[%c1_129, %c0_130, %c0_131] : memref<2x1x32xf32, #tpu.memory_space<vmem>>, vector<1x1x32xf32>
    %302 = vector.shape_cast %301 : vector<1x1x32xf32> to vector<1x32xf32>
    %c1_132 = arith.constant 1 : index
    %c0_133 = arith.constant 0 : index
    %c0_134 = arith.constant 0 : index
    %303 = vector.load %arg13[%c1_132, %c0_133, %c0_134] : memref<2x1x32xf32, #tpu.memory_space<vmem>>, vector<1x1x32xf32>
    %304 = vector.shape_cast %303 : vector<1x1x32xf32> to vector<1x32xf32>
    %cst_135 = arith.constant dense<0.000000e+00> : vector<5xf32>
    %305 = vector.multi_reduction <add>, %300, %cst_135 [1] : vector<5x32xf32> to vector<5xf32>
    %306 = vector.shape_cast %305 : vector<5xf32> to vector<5x1xf32>
    %cst_136 = arith.constant 3.200000e+01 : f32
    %307 = vector.broadcast %cst_136 : f32 to vector<5x1xf32>
    %308 = arith.divf %306, %307 : vector<5x1xf32>
    %309 = vector.broadcast %308 : vector<5x1xf32> to vector<5x32xf32>
    %310 = arith.subf %300, %309 : vector<5x32xf32>
    %311 = arith.mulf %310, %310 : vector<5x32xf32>
    %cst_137 = arith.constant dense<0.000000e+00> : vector<5xf32>
    %312 = vector.multi_reduction <add>, %311, %cst_137 [1] : vector<5x32xf32> to vector<5xf32>
    %313 = vector.shape_cast %312 : vector<5xf32> to vector<5x1xf32>
    %cst_138 = arith.constant 3.200000e+01 : f32
    %314 = vector.broadcast %cst_138 : f32 to vector<5x1xf32>
    %315 = arith.divf %313, %314 : vector<5x1xf32>
    %316 = vector.broadcast %308 : vector<5x1xf32> to vector<5x32xf32>
    %317 = arith.subf %300, %316 : vector<5x32xf32>
    %cst_139 = arith.constant 9.99999997E-7 : f32
    %318 = vector.broadcast %cst_139 : f32 to vector<5x1xf32>
    %319 = arith.addf %315, %318 : vector<5x1xf32>
    %320 = math.rsqrt %319 : vector<5x1xf32>
    %321 = vector.broadcast %320 : vector<5x1xf32> to vector<5x32xf32>
    %322 = arith.mulf %317, %321 : vector<5x32xf32>
    %323 = vector.broadcast %302 : vector<1x32xf32> to vector<5x32xf32>
    %324 = arith.mulf %322, %323 : vector<5x32xf32>
    %325 = vector.broadcast %304 : vector<1x32xf32> to vector<5x32xf32>
    %326 = arith.addf %324, %325 : vector<5x32xf32>
    %c1_140 = arith.constant 1 : index
    %c0_141 = arith.constant 0 : index
    %c0_142 = arith.constant 0 : index
    %327 = vector.load %arg14[%c1_140, %c0_141, %c0_142] : memref<2x32x128xf32, #tpu.memory_space<vmem>>, vector<1x32x128xf32>
    %328 = vector.shape_cast %327 : vector<1x32x128xf32> to vector<32x128xf32>
    %cst_143 = arith.constant dense<0.000000e+00> : vector<5x128xf32>
    %329 = tpu.matmul %326, %328, %cst_143 {dimension_numbers = #tpu.dot_dimension_numbers<[1], [0], [0], [1], [0, 0, 1, 1], [], []>} : vector<5x32xf32>, vector<32x128xf32>, vector<5x128xf32> -> vector<5x128xf32>
    %c1_144 = arith.constant 1 : index
    %c0_145 = arith.constant 0 : index
    %c0_146 = arith.constant 0 : index
    %330 = vector.load %arg15[%c1_144, %c0_145, %c0_146] : memref<2x1x128xf32, #tpu.memory_space<vmem>>, vector<1x1x128xf32>
    %331 = vector.shape_cast %330 : vector<1x1x128xf32> to vector<1x128xf32>
    %332 = vector.broadcast %331 : vector<1x128xf32> to vector<5x128xf32>
    %333 = arith.addf %329, %332 : vector<5x128xf32>
    %cst_147 = arith.constant 5.000000e-01 : f32
    %334 = vector.broadcast %cst_147 : f32 to vector<5x128xf32>
    %335 = arith.mulf %334, %333 : vector<5x128xf32>
    %cst_148 = arith.constant 0.707106769 : f32
    %336 = vector.broadcast %cst_148 : f32 to vector<5x128xf32>
    %337 = arith.mulf %333, %336 : vector<5x128xf32>
    %338 = math.erf %337 : vector<5x128xf32>
    %cst_149 = arith.constant 1.000000e+00 : f32
    %339 = vector.broadcast %cst_149 : f32 to vector<5x128xf32>
    %340 = arith.addf %339, %338 : vector<5x128xf32>
    %341 = arith.mulf %335, %340 : vector<5x128xf32>
    %c1_150 = arith.constant 1 : index
    %c0_151 = arith.constant 0 : index
    %c0_152 = arith.constant 0 : index
    %342 = vector.load %arg16[%c1_150, %c0_151, %c0_152] : memref<2x128x32xf32, #tpu.memory_space<vmem>>, vector<1x128x32xf32>
    %343 = vector.shape_cast %342 : vector<1x128x32xf32> to vector<128x32xf32>
    %cst_153 = arith.constant dense<0.000000e+00> : vector<5x32xf32>
    %344 = tpu.matmul %341, %343, %cst_153 {dimension_numbers = #tpu.dot_dimension_numbers<[1], [0], [0], [1], [0, 0, 1, 1], [], []>} : vector<5x128xf32>, vector<128x32xf32>, vector<5x32xf32> -> vector<5x32xf32>
    %c1_154 = arith.constant 1 : index
    %c0_155 = arith.constant 0 : index
    %c0_156 = arith.constant 0 : index
    %345 = vector.load %arg17[%c1_154, %c0_155, %c0_156] : memref<2x1x32xf32, #tpu.memory_space<vmem>>, vector<1x1x32xf32>
    %346 = vector.shape_cast %345 : vector<1x1x32xf32> to vector<1x32xf32>
    %347 = vector.broadcast %346 : vector<1x32xf32> to vector<5x32xf32>
    %348 = arith.addf %344, %347 : vector<5x32xf32>
    %349 = arith.addf %300, %348 : vector<5x32xf32>
    %350 = vector.extract_strided_slice %349 {offsets = [0, 0], sizes = [1, 32], strides = [1, 1]} : vector<5x32xf32> to vector<1x32xf32>
    %c0_157 = arith.constant 0 : index
    %c0_158 = arith.constant 0 : index
    %351 = vector.load %arg18[%c0_157, %c0_158] : memref<1x32xf32, #tpu.memory_space<vmem>>, vector<1x32xf32>
    %c0_159 = arith.constant 0 : index
    %c0_160 = arith.constant 0 : index
    %352 = vector.load %arg19[%c0_159, %c0_160] : memref<1x32xf32, #tpu.memory_space<vmem>>, vector<1x32xf32>
    %cst_161 = arith.constant dense<0.000000e+00> : vector<1xf32>
    %353 = vector.multi_reduction <add>, %350, %cst_161 [1] : vector<1x32xf32> to vector<1xf32>
    %354 = vector.shape_cast %353 : vector<1xf32> to vector<1x1xf32>
    %cst_162 = arith.constant 3.200000e+01 : f32
    %355 = vector.broadcast %cst_162 : f32 to vector<1x1xf32>
    %356 = arith.divf %354, %355 : vector<1x1xf32>
    %357 = vector.broadcast %356 : vector<1x1xf32> to vector<1x32xf32>
    %358 = arith.subf %350, %357 : vector<1x32xf32>
    %359 = arith.mulf %358, %358 : vector<1x32xf32>
    %cst_163 = arith.constant dense<0.000000e+00> : vector<1xf32>
    %360 = vector.multi_reduction <add>, %359, %cst_163 [1] : vector<1x32xf32> to vector<1xf32>
    %361 = vector.shape_cast %360 : vector<1xf32> to vector<1x1xf32>
    %cst_164 = arith.constant 3.200000e+01 : f32
    %362 = vector.broadcast %cst_164 : f32 to vector<1x1xf32>
    %363 = arith.divf %361, %362 : vector<1x1xf32>
    %364 = vector.broadcast %356 : vector<1x1xf32> to vector<1x32xf32>
    %365 = arith.subf %350, %364 : vector<1x32xf32>
    %cst_165 = arith.constant 9.99999997E-7 : f32
    %366 = vector.broadcast %cst_165 : f32 to vector<1x1xf32>
    %367 = arith.addf %363, %366 : vector<1x1xf32>
    %368 = math.rsqrt %367 : vector<1x1xf32>
    %369 = vector.broadcast %368 : vector<1x1xf32> to vector<1x32xf32>
    %370 = arith.mulf %365, %369 : vector<1x32xf32>
    %371 = arith.mulf %370, %351 : vector<1x32xf32>
    %372 = arith.addf %371, %352 : vector<1x32xf32>
    %c0_166 = arith.constant 0 : index
    %c0_167 = arith.constant 0 : index
    %373 = vector.load %arg20[%c0_166, %c0_167] : memref<32x128xf32, #tpu.memory_space<vmem>>, vector<32x128xf32>
    %cst_168 = arith.constant dense<0.000000e+00> : vector<1x128xf32>
    %374 = tpu.matmul %372, %373, %cst_168 {dimension_numbers = #tpu.dot_dimension_numbers<[1], [0], [0], [1], [0, 0, 1, 1], [], []>} : vector<1x32xf32>, vector<32x128xf32>, vector<1x128xf32> -> vector<1x128xf32>
    %c0_169 = arith.constant 0 : index
    %c0_170 = arith.constant 0 : index
    %375 = vector.load %arg21[%c0_169, %c0_170] : memref<1x128xf32, #tpu.memory_space<vmem>>, vector<1x128xf32>
    %376 = arith.addf %374, %375 : vector<1x128xf32>
    %c0_171 = arith.constant 0 : index
    %c0_172 = arith.constant 0 : index
    %c0_173 = arith.constant 0 : index
    %377 = vector.load %arg22[%c0_171, %c0_172, %c0_173] : memref<1x1x128xf32, #tpu.memory_space<vmem>>, vector<1x1x128xf32>
    %378 = vector.shape_cast %377 : vector<1x1x128xf32> to vector<1x128xf32>
    %379 = vector.shape_cast %376 : vector<1x128xf32> to vector<1x1x128xf32>
    tpu.vector_store %arg22[%c0_171, %c0_172, %c0_173], %379 {strides = array<i32>} : memref<1x1x128xf32, #tpu.memory_space<vmem>>, vector<1x1x128xf32>,
    return
  }
  func.func @transform_0(%arg0: i32) -> (i32, i32, i32) {
    %c0_i32 = arith.constant 0 : i32
    %c0_i32_0 = arith.constant 0 : i32
    %c0_i32_1 = arith.constant 0 : i32
    return %arg0, %c0_i32, %c0_i32_0 : i32, i32, i32
  }
  func.func @transform_1(%arg0: i32) -> (i32, i32) {
    %c0_i32 = arith.constant 0 : i32
    %c0_i32_0 = arith.constant 0 : i32
    %c0_i32_1 = arith.constant 0 : i32
    return %c0_i32, %c0_i32_0 : i32, i32
  }
  func.func @transform_2(%arg0: i32) -> (i32, i32) {
    %c0_i32 = arith.constant 0 : i32
    %c0_i32_0 = arith.constant 0 : i32
    %c0_i32_1 = arith.constant 0 : i32
    return %c0_i32, %c0_i32_0 : i32, i32
  }
  func.func @transform_3(%arg0: i32) -> (i32, i32) {
    %c0_i32 = arith.constant 0 : i32
    %c0_i32_0 = arith.constant 0 : i32
    %c0_i32_1 = arith.constant 0 : i32
    return %c0_i32, %c0_i32_0 : i32, i32
  }
  func.func @transform_4(%arg0: i32) -> (i32, i32) {
    %c0_i32 = arith.constant 0 : i32
    %c0_i32_0 = arith.constant 0 : i32
    %c0_i32_1 = arith.constant 0 : i32
    return %c0_i32, %c0_i32_0 : i32, i32
  }
  func.func @transform_5(%arg0: i32) -> (i32, i32, i32) {
    %c0_i32 = arith.constant 0 : i32
    %c0_i32_0 = arith.constant 0 : i32
    %c0_i32_1 = arith.constant 0 : i32
    %c0_i32_2 = arith.constant 0 : i32
    return %c0_i32, %c0_i32_0, %c0_i32_1 : i32, i32, i32
  }
  func.func @transform_6(%arg0: i32) -> (i32, i32, i32) {
    %c0_i32 = arith.constant 0 : i32
    %c0_i32_0 = arith.constant 0 : i32
    %c0_i32_1 = arith.constant 0 : i32
    %c0_i32_2 = arith.constant 0 : i32
    return %c0_i32, %c0_i32_0, %c0_i32_1 : i32, i32, i32
  }
  func.func @transform_7(%arg0: i32) -> (i32, i32, i32) {
    %c0_i32 = arith.constant 0 : i32
    %c0_i32_0 = arith.constant 0 : i32
    %c0_i32_1 = arith.constant 0 : i32
    %c0_i32_2 = arith.constant 0 : i32
    return %c0_i32, %c0_i32_0, %c0_i32_1 : i32, i32, i32
  }
  func.func @transform_8(%arg0: i32) -> (i32, i32, i32) {
    %c0_i32 = arith.constant 0 : i32
    %c0_i32_0 = arith.constant 0 : i32
    %c0_i32_1 = arith.constant 0 : i32
    %c0_i32_2 = arith.constant 0 : i32
    return %c0_i32, %c0_i32_0, %c0_i32_1 : i32, i32, i32
  }
  func.func @transform_9(%arg0: i32) -> (i32, i32, i32) {
    %c0_i32 = arith.constant 0 : i32
    %c0_i32_0 = arith.constant 0 : i32
    %c0_i32_1 = arith.constant 0 : i32
    %c0_i32_2 = arith.constant 0 : i32
    return %c0_i32, %c0_i32_0, %c0_i32_1 : i32, i32, i32
  }
  func.func @transform_10(%arg0: i32) -> (i32, i32, i32) {
    %c0_i32 = arith.constant 0 : i32
    %c0_i32_0 = arith.constant 0 : i32
    %c0_i32_1 = arith.constant 0 : i32
    %c0_i32_2 = arith.constant 0 : i32
    return %c0_i32, %c0_i32_0, %c0_i32_1 : i32, i32, i32
  }
  func.func @transform_11(%arg0: i32) -> (i32, i32, i32) {
    %c0_i32 = arith.constant 0 : i32
    %c0_i32_0 = arith.constant 0 : i32
    %c0_i32_1 = arith.constant 0 : i32
    %c0_i32_2 = arith.constant 0 : i32
    return %c0_i32, %c0_i32_0, %c0_i32_1 : i32, i32, i32
  }
  func.func @transform_12(%arg0: i32) -> (i32, i32, i32) {
    %c0_i32 = arith.constant 0 : i32
    %c0_i32_0 = arith.constant 0 : i32
    %c0_i32_1 = arith.constant 0 : i32
    %c0_i32_2 = arith.constant 0 : i32
    return %c0_i32, %c0_i32_0, %c0_i32_1 : i32, i32, i32
  }
  func.func @transform_13(%arg0: i32) -> (i32, i32, i32) {
    %c0_i32 = arith.constant 0 : i32
    %c0_i32_0 = arith.constant 0 : i32
    %c0_i32_1 = arith.constant 0 : i32
    %c0_i32_2 = arith.constant 0 : i32
    return %c0_i32, %c0_i32_0, %c0_i32_1 : i32, i32, i32
  }
  func.func @transform_14(%arg0: i32) -> (i32, i32, i32) {
    %c0_i32 = arith.constant 0 : i32
    %c0_i32_0 = arith.constant 0 : i32
    %c0_i32_1 = arith.constant 0 : i32
    %c0_i32_2 = arith.constant 0 : i32
    return %c0_i32, %c0_i32_0, %c0_i32_1 : i32, i32, i32
  }
  func.func @transform_15(%arg0: i32) -> (i32, i32, i32) {
    %c0_i32 = arith.constant 0 : i32
    %c0_i32_0 = arith.constant 0 : i32
    %c0_i32_1 = arith.constant 0 : i32
    %c0_i32_2 = arith.constant 0 : i32
    return %c0_i32, %c0_i32_0, %c0_i32_1 : i32, i32, i32
  }
  func.func @transform_16(%arg0: i32) -> (i32, i32, i32) {
    %c0_i32 = arith.constant 0 : i32
    %c0_i32_0 = arith.constant 0 : i32
    %c0_i32_1 = arith.constant 0 : i32
    %c0_i32_2 = arith.constant 0 : i32
    return %c0_i32, %c0_i32_0, %c0_i32_1 : i32, i32, i32
  }
  func.func @transform_17(%arg0: i32) -> (i32, i32) {
    %c0_i32 = arith.constant 0 : i32
    %c0_i32_0 = arith.constant 0 : i32
    %c0_i32_1 = arith.constant 0 : i32
    return %c0_i32, %c0_i32_0 : i32, i32
  }
  func.func @transform_18(%arg0: i32) -> (i32, i32) {
    %c0_i32 = arith.constant 0 : i32
    %c0_i32_0 = arith.constant 0 : i32
    %c0_i32_1 = arith.constant 0 : i32
    return %c0_i32, %c0_i32_0 : i32, i32
  }
  func.func @transform_19(%arg0: i32) -> (i32, i32) {
    %c0_i32 = arith.constant 0 : i32
    %c0_i32_0 = arith.constant 0 : i32
    %c0_i32_1 = arith.constant 0 : i32
    return %c0_i32, %c0_i32_0 : i32, i32
  }
  func.func @transform_20(%arg0: i32) -> (i32, i32) {
    %c0_i32 = arith.constant 0 : i32
    %c0_i32_0 = arith.constant 0 : i32
    %c0_i32_1 = arith.constant 0 : i32
    return %c0_i32, %c0_i32_0 : i32, i32
  }
  func.func @transform_21(%arg0: i32) -> (i32, i32, i32) {
    %c0_i32 = arith.constant 0 : i32
    %c0_i32_0 = arith.constant 0 : i32
    %c0_i32_1 = arith.constant 0 : i32
    return %arg0, %c0_i32, %c0_i32_0 : i32, i32, i32
  }
}

</mosaic_0001>

<bundles_post_ra>
// kernel: deit_forward.1
= control target key start
LH: loop header
LB: loop body
LE: loop exit
PB: predicated region body
PF: predicated region fallthrough
CT: control target
= control target key end

     0   :  { %s5689_s0 = inlined_call_operand.vmem [shape: f32[2,5,768], index: 0, kind: input, shape index: {}]   ;;  %s5690_s1 = inlined_call_operand.vmem [shape: f32[768,32], index: 1, kind: input, shape index: {}]   ;;  %s5691_s2 = inlined_call_operand.vmem [shape: f32[1,32], index: 2, kind: input, shape index: {}]   ;;  %s5692_s3 = inlined_call_operand.vmem [shape: f32[1,32], index: 3, kind: input, shape index: {}]   ;;  %s5693_s4 = inlined_call_operand.vmem [shape: f32[5,32], index: 4, kind: input, shape index: {}]   ;;  %s5694_s5 = inlined_call_operand.vmem [shape: f32[2,1,32], index: 5, kind: input, shape index: {}]   ;;  %s5695_s6 = inlined_call_operand.vmem [shape: f32[2,1,32], index: 6, kind: input, shape index: {}]   ;;  %s5696_s7 = inlined_call_operand.vmem [shape: f32[2,32,96], index: 7, kind: input, shape index: {}]   ;;  %s5697_s8 = inlined_call_operand.vmem [shape: f32[2,1,96], index: 8, kind: input, shape index: {}]   ;;  %s5698_s9 = inlined_call_operand.vmem [shape: f32[2,32,32], index: 9, kind: input, shape index: {}]   ;;  %s5699_s10 = inlined_call_operand.vmem [shape: f32[2,1,32], index: 10, kind: input, shape index: {}]   ;;  %s5700_s11 = inlined_call_operand.vmem [shape: f32[2,1,32], index: 11, kind: input, shape index: {}]   ;;  %s5701_s12 = inlined_call_operand.vmem [shape: f32[2,1,32], index: 12, kind: input, shape index: {}]   ;;  %s5702_s13 = inlined_call_operand.vmem [shape: f32[2,32,128], index: 13, kind: input, shape index: {}]   ;;  %s5703_s14 = inlined_call_operand.vmem [shape: f32[2,1,128], index: 14, kind: input, shape index: {}]   ;;  %s5704_s15 = inlined_call_operand.vmem [shape: f32[2,128,32], index: 15, kind: input, shape index: {}]   ;;  %s5705_s16 = inlined_call_operand.vmem [shape: f32[2,1,32], index: 16, kind: input, shape index: {}]   ;;  %s5706_s17 = inlined_call_operand.vmem [shape: f32[1,32], index: 17, kind: input, shape index: {}]   ;;  %s5707_s18 = inlined_call_operand.vmem [shape: f32[1,32], index: 18, kind: input, shape index: {}]   ;;  %s5708_s19 = inlined_call_operand.vmem [shape: f32[32,128], index: 19, kind: input, shape index: {}]   ;;  %s5709_s20 = inlined_call_operand.vmem [shape: f32[1,128], index: 20, kind: input, shape index: {}]   ;;  %s5710_s21 = inlined_call_operand.hbm [shape: f32[2,1,128], index: 21, kind: output, shape index: {}]  }
   0x1   :  { %5729 = sst [smem:[#allocation11_spill]] %s5689_s0 }
   0x2   :  { %5730 = sst [smem:[#allocation12_spill]] %s5690_s1 }
   0x3   :  { %5731 = sst [smem:[#allocation13_spill]] %s5691_s2 }
   0x4   :  { %5732 = sst [smem:[#allocation14_spill]] %s5692_s3 }
   0x5   :  { %5733 = sst [smem:[#allocation15_spill]] %s5693_s4 }
   0x6   :  { %5734 = sst [smem:[#allocation16_spill]] %s5694_s5 }
   0x7   :  { %5735 = sst [smem:[#allocation17_spill]] %s5709_s20 }
   0x8   :  { %5736 = sst [smem:[#allocation18_spill]] %s5710_s21 }
   0x9   :  { %26 = vsyncpa [#allocation3], 0 }
   0xa   :  { %28 = vsyncpa [#allocation3 + $0x1], 0  ;;  %s4791_s2 = smov 0   ;;  %s4793_s25 = smov 0  }
   0xb   :  { %s4795_s26 = smov 0   ;;  %s4797_s27 = smov 0  }
   0xc LB: > { %5737 = sst [smem:[#allocation5_spill]] %s4652_s2  ;;  %s4812_s3 = sadd.s32 4294967295, %s4664_s27   ;;  %s4664_s27 = sphi %s4797_s27, %s5765_s27   ;;  %s4660_s26 = sphi %s4795_s26, %s5767_s26   ;;  %s4656_s25 = sphi %s4793_s25, %s5769_s25   ;;  %s4652_s2 = sphi %s4791_s2, %s5768_s2  }
   0xd   : > { %5738 = sst [smem:[#allocation6_spill]] %s4660_s26  ;;  %s3764_s28 = sadd.s32 4294967294, %s4664_s27  }
   0xe   : > { %5739 = sst [smem:[#allocation7_spill]] %s4664_s27  ;;  %s4816_s29 = sadd.s32 1, %s4664_s27  }
   0xf   : > { %5740 = sst [smem:[#allocation8_spill]] %s4816_s29  ;;  %s487_s0 = sadd.s32 1, %s4660_s26 }
  0x10   : > { %s484_s4 = ssub.s32 %s4664_s27, %s4816_s29  ;;  %p497_p0 = scmp.ne.s32.totalorder %s4660_s26, %s4656_s25 }
  0x11   : > { %p485_p1 = scmp.eq.s32.totalorder %s484_s4, 0  ;;  %p498_p2 = scmp.eq.s32.totalorder %s4812_s3, 1 }
  0x12   : > { %p503_p3 = scmp.ne.s32.totalorder %s4656_s25, %s4652_s2  ;;  %p504_p4 = scmp.eq.s32.totalorder %s3764_s28, 1 }
  0x13   : > { %s4827_s30 = scalar_select %p485_p1, %s4660_s26, %s487_s0  }
  0x14   : > { %p4829_p5 = por %p498_p2, %p497_p0  ;;  %p4833_p6 = por %p504_p4, %p503_p3 }
  0x15   : > { %5741 = sst [smem:[#allocation9_spill]] %s4827_s30  ;;  %p3767_p7 = scmp.ge.s32.totalorder %s4664_s27, 1 }
  0x16   : > { %s5743_s22 = scalar_select %p4833_p6, 1, 0 }
  0x17   : > { %p590_p8 = scmp.lt.s32.totalorder %s4664_s27, 3 }
  0x18   : > { %5744 = sst [smem:[#allocation10_spill]] %s5743_s22 }
  0x19   : > { %p591_p9 = pnand %p3767_p7, %p590_p8 }
  0x1a   : > { %s5745_s24 = sld [smem:[#allocation12_spill]] (!%p591_p9)  ;;  %p649_p10 = scmp.lt.s32.totalorder (!%p591_p9), %s4812_s3, 1  ;;  %vm988_vm1 = vcmask (!%p591_p9), 258048   ;;  %vm4667_vm2 = vmmov (!%p591_p9), 0   ;;  %vm1028_vm3 = vcmask (!%p591_p9), 261120   ;;  %vm1110_vm4 = vcmask (!%p591_p9), 64512  }
  0x1b   : > { %594 = sbr.rel (%p591_p9) target bundleno = 8667 (0x21db), region = 104  ;;  %s5746_s23 = sld [smem:[#allocation11_spill]] (!%p591_p9)  ;;  %vm1204_vm5 = vcmask (!%p591_p9), 1044480   ;;  %vm1186_vm6 = vcmask (!%p591_p9), 36864   ;;  %vm1200_vm7 = vcmask (!%p591_p9), 39936   ;;  %vm3601_vm8 = vcmask (!%p591_p9), 253952  }
  0x1c   : > { %s5747_s28 = sld [smem:[#allocation13_spill]] (!%p591_p9)  ;;  %s5748_s2 = sld [smem:[#allocation14_spill]] (!%p591_p9) }
  0x1d   : > { %s5749_s27 = sld [smem:[#allocation15_spill]] (!%p591_p9)  ;;  %s5750_s22 = sld [smem:[#allocation16_spill]] (!%p591_p9) }
  0x1e   : > { %s5727_s21 = smov (!%p591_p9), 88   ;;  %s5724_s4 = smov (!%p591_p9), 80  }
  0x1f   : > { %s5726_s29 = smov (!%p591_p9), 56   ;;  %s5722_s20 = smov (!%p591_p9), 40  }
  0x20   : > { %v676_v0 = vld [vmem:[%s5745_s24 + $0x80] sm:$0xff] (!%p591_p9)  ;;  %v677_v1 = vld [vmem:[%s5745_s24 + $0x88] sm:$0xff] (!%p591_p9)  ;;  %v678_v11 = vld [vmem:[%s5745_s24 + $0x90] sm:$0xff] (!%p591_p9) }
  0x21   : > { %v660_v2 = vld [vmem:[%s5745_s24] sm:$0xff] (!%p591_p9)  ;;  %v4328_v3 = vpack.c.bf16 (!%p591_p9), %v677_v1, %v676_v0  ;;  %v661_v4 = vld [vmem:[%s5745_s24 + $0x8] sm:$0xff] (!%p591_p9)  ;;  %v679_v13 = vld [vmem:[%s5745_s24 + $0x98] sm:$0xff] (!%p591_p9) }
  0x22   : > { %v708_v5 = vld [vmem:[%s5745_s24 + $0x180] sm:$0xff]  ;;  %v709_v6 = vld [vmem:[%s5745_s24 + $0x188] sm:$0xff]  ;;  %v4330_v7 = vpack.c.bf16 %v661_v4, %v660_v2  ;;  %v662_v14 = vld [vmem:[%s5745_s24 + $0x10] sm:$0xff]  ;;  %v4332_v16 = vpack.c.bf16 %v679_v13, %v678_v11  ;;  %s4933_s26 = scalar_select %p649_p10, %s4812_s3, 1 }
  0x23   : > { %v4360_v8 = vpack.c.bf16 %v709_v6, %v708_v5  ;;  %v692_v9 = vld [vmem:[%s5745_s24 + $0x100] sm:$0xff]  ;;  %v693_v10 = vld [vmem:[%s5745_s24 + $0x108] sm:$0xff]  ;;  %4329 = vmatprep.subr.bf16.mxu0 %v4328_v3  ;;  %v663_v15 = vld [vmem:[%s5745_s24 + $0x18] sm:$0xff] }
  0x24   : > { %v4362_v12 = vpack.c.bf16 %v693_v10, %v692_v9  ;;  %4331 = vmatpush3.bf16.msra.mxu0 %v4330_v7  ;;  %v4334_v17 = vpack.c.bf16 %v663_v15, %v662_v14  ;;  %v710_v18 = vld [vmem:[%s5745_s24 + $0x190] sm:$0xff]  ;;  %v711_v19 = vld [vmem:[%s5745_s24 + $0x198] sm:$0xff]  ;;  %v680_v23 = vld [vmem:[%s5745_s24 + $0xa0] sm:$0xff]  ;;  %s4502_s30 = smul.u32 48, %s4933_s26  ;;  %s4670_s26 = smov 96  }
  0x25   : > { %4361 = vmatprep.subr.bf16.mxu1 %v4360_v8  ;;  %v694_v20 = vld [vmem:[%s5745_s24 + $0x110] sm:$0xff]  ;;  %v4364_v21 = vpack.c.bf16 %v711_v19, %v710_v18  ;;  %v695_v22 = vld [vmem:[%s5745_s24 + $0x118] sm:$0xff]  ;;  %v681_v24 = vld [vmem:[%s5745_s24 + $0xa8] sm:$0xff]  ;;  %4333 = vmatprep.subr.bf16.mxu0 %v4332_v16 }
  0x26   : > { %4363 = vmatpush3.bf16.msra.mxu1 %v4362_v12  ;;  %v4366_v25 = vpack.c.bf16 %v695_v22, %v694_v20  ;;  %v4336_v26 = vpack.c.bf16 %v681_v24, %v680_v23  ;;  %v664_v27 = vld [vmem:[%s5745_s24 + $0x20] sm:$0xff]  ;;  %v665_v28 = vld [vmem:[%s5745_s24 + $0x28] sm:$0xff]  ;;  %v682_v35 = vld [vmem:[%s5745_s24 + $0xb0] sm:$0xff]  ;;  %s4990_s1 = scalar_lea.vmem %s5746_s23, %s4502_s30  ;;  %s4669_s23 = smov 64  }
  0x27   : > { %v712_v29 = vld [vmem:[%s5745_s24 + $0x1a0] sm:$0xff]  ;;  %4365 = vmatprep.subr.bf16.mxu1 %v4364_v21  ;;  %v713_v30 = vld [vmem:[%s5745_s24 + $0x1a8] sm:$0xff]  ;;  %v4338_v33 = vpack.c.bf16 %v665_v28, %v664_v27  ;;  %v683_v36 = vld [vmem:[%s5745_s24 + $0xb8] sm:$0xff]  ;;  %s5720_s30 = smov 104  }
  0x28   : > { %v696_v31 = vld [vmem:[%s5745_s24 + $0x120] sm:$0xff]  ;;  %v697_v32 = vld [vmem:[%s5745_s24 + $0x128] sm:$0xff]  ;;  %4335 = vmatpush3.bf16.msra.mxu0 %v4334_v17  ;;  %v4368_v34 = vpack.c.bf16 %v713_v30, %v712_v29  ;;  %v666_v37 = vld [vmem:[%s5745_s24 + $0x30] sm:$0xff]  ;;  %v4340_v39 = vpack.c.bf16 %v683_v36, %v682_v35 }
  0x29   : > { %4337 = vmatprep.subr.bf16.mxu0 %v4336_v26  ;;  %v4370_v38 = vpack.c.bf16 %v697_v32, %v696_v31  ;;  %v667_v40 = vld [vmem:[%s5745_s24 + $0x38] sm:$0xff]  ;;  %v714_v41 = vld [vmem:[%s5745_s24 + $0x1b0] sm:$0xff]  ;;  %v684_v46 = vld [vmem:[%s5745_s24 + $0xc0] sm:$0xff] }
  0x2a   : > { %4367 = vmatpush3.bf16.msra.mxu1 %v4366_v25  ;;  %v715_v42 = vld [vmem:[%s5745_s24 + $0x1b8] sm:$0xff]  ;;  %v698_v44 = vld [vmem:[%s5745_s24 + $0x130] sm:$0xff]  ;;  %v685_v47 = vld [vmem:[%s5745_s24 + $0xc8] sm:$0xff]  ;;  %v4342_v48 = vpack.c.bf16 %v667_v40, %v666_v37 }
  0x2b   : > { %4369 = vmatprep.subr.bf16.mxu1 %v4368_v34  ;;  %v4372_v43 = vpack.c.bf16 %v715_v42, %v714_v41  ;;  %v699_v45 = vld [vmem:[%s5745_s24 + $0x138] sm:$0xff]  ;;  %v716_v49 = vld [vmem:[%s5745_s24 + $0x1c0] sm:$0xff]  ;;  %v717_v50 = vld [vmem:[%s5745_s24 + $0x1c8] sm:$0xff]  ;;  %v4344_v52 = vpack.c.bf16 %v685_v47, %v684_v46 }
  0x2c   : > { %4339 = vmatpush3.bf16.msra.mxu0 %v4338_v33  ;;  %v4374_v51 = vpack.c.bf16 %v699_v45, %v698_v44  ;;  %v668_v53 = vld [vmem:[%s5745_s24 + $0x40] sm:$0xff]  ;;  %v669_v54 = vld [vmem:[%s5745_s24 + $0x48] sm:$0xff]  ;;  %v4376_v56 = vpack.c.bf16 %v717_v50, %v716_v49  ;;  %v686_v58 = vld [vmem:[%s5745_s24 + $0xd0] sm:$0xff] }
  0x2d   : > { %4341 = vmatprep.subr.bf16.mxu0 %v4340_v39  ;;  %v700_v55 = vld [vmem:[%s5745_s24 + $0x140] sm:$0xff]  ;;  %v701_v57 = vld [vmem:[%s5745_s24 + $0x148] sm:$0xff]  ;;  %v687_v59 = vld [vmem:[%s5745_s24 + $0xd8] sm:$0xff]  ;;  %v4346_v62 = vpack.c.bf16 %v669_v54, %v668_v53 }
  0x2e   : > { %4371 = vmatpush3.bf16.msra.mxu1 %v4370_v38  ;;  %v718_v60 = vld [vmem:[%s5745_s24 + $0x1d0] sm:$0xff]  ;;  %v719_v61 = vld [vmem:[%s5745_s24 + $0x1d8] sm:$0xff]  ;;  %v4378_v63 = vpack.c.bf16 %v701_v57, %v700_v55  ;;  %v4348_v0 = vpack.c.bf16 %v687_v59, %v686_v58  ;;  %v688_v6 = vld [vmem:[%s5745_s24 + $0xe0] sm:$0xff] }
  0x2f   : > { %4373 = vmatprep.subr.bf16.mxu1 %v4372_v43  ;;  %v670_v1 = vld [vmem:[%s5745_s24 + $0x50] sm:$0xff]  ;;  %v671_v2 = vld [vmem:[%s5745_s24 + $0x58] sm:$0xff]  ;;  %v4380_v4 = vpack.c.bf16 %v719_v61, %v718_v60  ;;  %v689_v7 = vld [vmem:[%s5745_s24 + $0xe8] sm:$0xff] }
  0x30   : > { %4343 = vmatpush3.bf16.msra.mxu0 %v4342_v48  ;;  %v702_v3 = vld [vmem:[%s5745_s24 + $0x150] sm:$0xff]  ;;  %v703_v5 = vld [vmem:[%s5745_s24 + $0x158] sm:$0xff]  ;;  %v720_v8 = vld [vmem:[%s5745_s24 + $0x1e0] sm:$0xff]  ;;  %v4350_v10 = vpack.c.bf16 %v671_v2, %v670_v1  ;;  %v4352_v14 = vpack.c.bf16 %v689_v7, %v688_v6 }
  0x31   : > { %4345 = vmatprep.subr.bf16.mxu0 %v4344_v52  ;;  %v721_v9 = vld [vmem:[%s5745_s24 + $0x1e8] sm:$0xff]  ;;  %v672_v11 = vld [vmem:[%s5745_s24 + $0x60] sm:$0xff]  ;;  %v4382_v13 = vpack.c.bf16 %v703_v5, %v702_v3  ;;  %v690_v19 = vld [vmem:[%s5745_s24 + $0xf0] sm:$0xff] }
  0x32   : > { %4375 = vmatpush3.bf16.msra.mxu1 %v4374_v51  ;;  %v655_v12 = vld [vmem:[%s4990_s1 + $0x8] sm:$0x1f]  ;;  %v704_v16 = vld [vmem:[%s5745_s24 + $0x160] sm:$0xff]  ;;  %v4384_v18 = vpack.c.bf16 %v721_v9, %v720_v8  ;;  %v691_v20 = vld [vmem:[%s5745_s24 + $0xf8] sm:$0xff] }
  0x33   : > { %4377 = vmatprep.subr.bf16.mxu1 %v4376_v56  ;;  %v673_v15 = vld [vmem:[%s5745_s24 + $0x68] sm:$0xff]  ;;  %827 = vmatprep.mubr.f32.mxu0 %v655_v12  ;;  %v657_v21 = vld [vmem:[%s4990_s1 + $0x18] sm:$0x1f]  ;;  %v722_v22 = vld [vmem:[%s5745_s24 + $0x1f0] sm:$0xff]  ;;  %v4356_v26 = vpack.c.bf16 %v691_v20, %v690_v19 }
  0x34   : > { %4347 = vmatpush3.bf16.msra.mxu0 %v4346_v62  ;;  %v705_v17 = vld [vmem:[%s5745_s24 + $0x168] sm:$0xff]  ;;  %v723_v23 = vld [vmem:[%s5745_s24 + $0x1f8] sm:$0xff]  ;;  %897 = vmatprep.mubr.f32.mxu1 %v657_v21  ;;  %v4354_v24 = vpack.c.bf16 %v673_v15, %v672_v11  ;;  %v674_v27 = vld [vmem:[%s5745_s24 + $0x70] sm:$0xff] }
  0x35   : > { %4349 = vmatprep.subr.bf16.mxu0 %v4348_v0  ;;  %v4386_v25 = vpack.c.bf16 %v705_v17, %v704_v16  ;;  %v675_v28 = vld [vmem:[%s5745_s24 + $0x78] sm:$0xff]  ;;  %v706_v29 = vld [vmem:[%s5745_s24 + $0x170] sm:$0xff]  ;;  %v4388_v30 = vpack.c.bf16 %v723_v23, %v722_v22  ;;  %v740_v32 = vld [vmem:[%s5745_s24 + $0x280] sm:$0xff] }
  0x36   : > { %4379 = vmatpush3.bf16.msra.mxu1 %v4378_v63  ;;  %v707_v31 = vld [vmem:[%s5745_s24 + $0x178] sm:$0xff]  ;;  %v741_v33 = vld [vmem:[%s5745_s24 + $0x288] sm:$0xff]  ;;  %v4358_v34 = vpack.c.bf16 %v675_v28, %v674_v27  ;;  %v724_v37 = vld [vmem:[%s5745_s24 + $0x200] sm:$0xff] }
  0x37   : > { %4381 = vmatprep.subr.bf16.mxu1 %v4380_v4  ;;  %v4390_v35 = vpack.c.bf16 %v707_v31, %v706_v29  ;;  %v4392_v36 = vpack.c.bf16 %v741_v33, %v740_v32  ;;  %v725_v38 = vld [vmem:[%s5745_s24 + $0x208] sm:$0xff]  ;;  %v742_v39 = vld [vmem:[%s5745_s24 + $0x290] sm:$0xff]  ;;  %v743_v40 = vld [vmem:[%s5745_s24 + $0x298] sm:$0xff]  ;;  %v973_v31 = vlaneseq }
  0x38   : > { %4351 = vmatpush3.bf16.msra.mxu0 %v4350_v10  ;;  %v654_v41 = vld [vmem:[%s4990_s1] sm:$0x1f]  ;;  %v4394_v42 = vpack.c.bf16 %v725_v38, %v724_v37  ;;  %v656_v43 = vld [vmem:[%s4990_s1 + $0x10] sm:$0x1f]  ;;  %v4396_v44 = vpack.c.bf16 %v743_v40, %v742_v39  ;;  %v727_v46 = vld [vmem:[%s5745_s24 + $0x218] sm:$0xff] }
  0x39   : > { %4353 = vmatprep.subr.bf16.mxu0 %v4352_v14  ;;  %v726_v45 = vld [vmem:[%s5745_s24 + $0x210] sm:$0xff]  ;;  %v744_v47 = vld [vmem:[%s5745_s24 + $0x2a0] sm:$0xff]  ;;  %v745_v48 = vld [vmem:[%s5745_s24 + $0x2a8] sm:$0xff]  ;;  %v974_v32 = vshrl.u32 %v973_v31, 7 }
  0x3a   : > { %4383 = vmatpush3.bf16.msra.mxu1 %v4382_v13  ;;  %v659_v49 = vld [vmem:[%s4990_s1 + $0x28] sm:$0x1f]  ;;  %v4398_v50 = vpack.c.bf16 %v727_v46, %v726_v45  ;;  %v4400_v51 = vpack.c.bf16 %v745_v48, %v744_v47  ;;  %v728_v52 = vld [vmem:[%s5745_s24 + $0x220] sm:$0xff]  ;;  %v746_v54 = vld [vmem:[%s5745_s24 + $0x2b0] sm:$0xff] }
  0x3b   : > { %4385 = vmatprep.subr.bf16.mxu1 %v4384_v18  ;;  %v729_v53 = vld [vmem:[%s5745_s24 + $0x228] sm:$0xff]  ;;  %v747_v55 = vld [vmem:[%s5745_s24 + $0x2b8] sm:$0xff]  ;;  %v730_v58 = vld [vmem:[%s5745_s24 + $0x230] sm:$0xff]  ;;  %vm975_vm0 = vcmp.eq.s32.totalorder %v974_v32, 0 }
  0x3c   : > { %4355 = vmatpush3.bf16.msra.mxu0 %v4354_v24  ;;  %v4402_v56 = vpack.c.bf16 %v729_v53, %v728_v52  ;;  %v4404_v57 = vpack.c.bf16 %v747_v55, %v746_v54  ;;  %v731_v59 = vld [vmem:[%s5745_s24 + $0x238] sm:$0xff]  ;;  %v748_v60 = vld [vmem:[%s5745_s24 + $0x2c0] sm:$0xff]  ;;  %v749_v61 = vld [vmem:[%s5745_s24 + $0x2c8] sm:$0xff]  ;;  %v4668_v54 = vmov 0.0  }
  0x3d   : > { %4357 = vmatprep.subr.bf16.mxu0 %v4356_v26  ;;  %v4406_v62 = vpack.c.bf16 %v731_v59, %v730_v58  ;;  %v4408_v63 = vpack.c.bf16 %v749_v61, %v748_v60  ;;  %v732_v0 = vld [vmem:[%s5745_s24 + $0x240] sm:$0xff]  ;;  %v733_v1 = vld [vmem:[%s5745_s24 + $0x248] sm:$0xff]  ;;  %v750_v2 = vld [vmem:[%s5745_s24 + $0x2d0] sm:$0xff] }
  0x3e   : > { %4387 = vmatpush3.bf16.msra.mxu1 %v4386_v25  ;;  %v751_v3 = vld [vmem:[%s5745_s24 + $0x2d8] sm:$0xff]  ;;  %v4410_v4 = vpack.c.bf16 %v733_v1, %v732_v0  ;;  %v734_v6 = vld [vmem:[%s5745_s24 + $0x250] sm:$0xff]  ;;  %v752_v8 = vld [vmem:[%s5745_s24 + $0x2e0] sm:$0xff] }
  0x3f   : > { %4389 = vmatprep.subr.bf16.mxu1 %v4388_v30  ;;  %v4412_v5 = vpack.c.bf16 %v751_v3, %v750_v2  ;;  %v735_v7 = vld [vmem:[%s5745_s24 + $0x258] sm:$0xff]  ;;  %v753_v9 = vld [vmem:[%s5745_s24 + $0x2e8] sm:$0xff]  ;;  %v736_v12 = vld [vmem:[%s5745_s24 + $0x260] sm:$0xff] }
  0x40   : > { %4359 = vmatpush3.bf16.msra.mxu0 %v4358_v34  ;;  %v4414_v10 = vpack.c.bf16 %v735_v7, %v734_v6  ;;  %v4416_v11 = vpack.c.bf16 %v753_v9, %v752_v8  ;;  %v737_v13 = vld [vmem:[%s5745_s24 + $0x268] sm:$0xff]  ;;  %v754_v14 = vld [vmem:[%s5745_s24 + $0x2f0] sm:$0xff]  ;;  %v755_v15 = vld [vmem:[%s5745_s24 + $0x2f8] sm:$0xff] }
  0x41   : > { %4393 = vmatprep.subr.bf16.mxu0 %v4392_v36  ;;  %v4418_v16 = vpack.c.bf16 %v737_v13, %v736_v12  ;;  %v4420_v17 = vpack.c.bf16 %v755_v15, %v754_v14  ;;  %v738_v18 = vld [vmem:[%s5745_s24 + $0x270] sm:$0xff]  ;;  %v739_v19 = vld [vmem:[%s5745_s24 + $0x278] sm:$0xff]  ;;  %v658_v21 = vld [vmem:[%s4990_s1 + $0x20] sm:$0x1f]  ;;  %s5725_s1 = smov 112  }
  0x42   : > { %4391 = vmatpush3.bf16.msra.mxu1 %v4390_v35  ;;  %v4422_v20 = vpack.c.bf16 %v739_v19, %v738_v18  ;;  %v3769_v23 = vld [vmem:[%s5747_s28] ss:$0 sm:$0xff]  ;;  %v1018_v48 = vld [vmem:[%s5696_s7 + $0x8] sm:$0xff]  ;;  %v1020_v52 = vld [vmem:[%s5696_s7 + $0x18] sm:$0xff]  ;;  %s5728_s28 = smov 120  }
  0x43   : > { %828 = vmatmul.mubr.f32.vlgmr.msra.gmra.mrb[0].mxu0 %v654_v41  ;;  %v3770_v36 = vld [vmem:[%s5748_s2] ss:$0 sm:$0xff]  ;;  %4094 = vmatprep.subr.mxu1 %v4668_v54  ;;  %s5721_s2 = smov 48  }
  0x44   : > { %4395 = vmatpush3.bf16.msra.mxu0 %v4394_v42  ;;  %967 = vmatprep.mubr.f32.mxu0 %v659_v49  ;;  %v984_v38 = vld [vmem:[%s5749_s27] sm:$0x1f]  ;;  %s5723_s27 = smov 72  }
  0x45   : > { %898 = vmatmul.mubr.f32.vlgmr.msra.gmra.mrb[0].mxu1 %v656_v43  ;;  %4397 = vmatprep.subr.bf16.mxu0 %v4396_v44  ;;  %v1017_v47 = vld [vmem:[%s5696_s7] sm:$0xff] }
  0x46   : > { %v4425_v49 = vpack.c.bf16 %v1018_v48, %v1017_v47  ;;  %4096 = vmatprep.mubr.msk.f32.mxu1 %vm4667_vm2, %v4668_v54  ;;  %v3771_v59 = vld [vmem:[%s5750_s22] ss:$0 sm:$0xff] }
  0x47   : > { %v3772_v61 = vld [vmem:[%s5695_s6] ss:$0 sm:$0xff] }
  0x48   : > { %4399 = vmatpush3.bf16.msra.mxu0 %v4398_v50  ;;  %v4666_v50 = vmov 0.0|0.0   ;;  %v3773_v0 = vld [vmem:[%s5697_s8] ss:$0 sm:$0xff] }
  0x49   : > { %4401 = vmatprep.subr.bf16.mxu0 %v4400_v51  ;;  %v1019_v51 = vld [vmem:[%s5696_s7 + $0x10] sm:$0xff]  ;;  %v1103_v47 = vld [vmem:[%s5698_s9] sm:$0xff] }
  0x4a   : > { %v4428_v53 = vpack.c.bf16 %v1020_v52, %v1019_v51 }
  0x4c   : > { %4403 = vmatpush3.bf16.msra.mxu0 %v4402_v56 }
  0x4d   : > { %4405 = vmatprep.subr.bf16.mxu0 %v4404_v57 }
  0x50   : > { %4407 = vmatpush3.bf16.msra.mxu0 %v4406_v62 }
  0x51   : > { %4409 = vmatprep.subr.bf16.mxu0 %v4408_v63 }
  0x54   : > { %4411 = vmatpush3.bf16.msra.mxu0 %v4410_v4 }
  0x55   : > { %4413 = vmatprep.subr.bf16.mxu0 %v4412_v5 }
  0x58   : > { %4415 = vmatpush3.bf16.msra.mxu0 %v4414_v10 }
  0x59   : > { %4417 = vmatprep.subr.bf16.mxu0 %v4416_v11 }
  0x5c   : > { %4419 = vmatpush3.bf16.msra.mxu0 %v4418_v16 }
  0x5d   : > { %4421 = vmatprep.subr.bf16.mxu0 %v4420_v17 }
  0x60   : > { %4423 = vmatpush3.bf16.msra.mxu0 %v4422_v20 }
  0x61   : > { %4424 = vmatprep.subr.bf16.mxu0 %v4666_v50 }
  0x63   : > { %968 = vmatmul.mubr.f32.vlgmr.msra.gmra.mrb[2].mxu0 %v658_v21 }
  0x64   : > { %4426 = vmatpush3.bf16.msra.mxu0 %v4425_v49  ;;  %4091 = vmatprep.mubr.msk.f32.mxu0 %vm4667_vm2, %v4668_v54 }
  0x65   : > { %4427 = vmatprep.subr.bf16.mxu0 %v4666_v50 }
  0x68   : > { %4429 = vmatpush3.bf16.msra.mxu0 %v4428_v53 }
  0x69   : > { %4124 = vmatprep.subr.mxu0 %v4668_v54 }
 0x116   : > { %v3903_v22 = vpop.f32.mrb[0].mxu0 }
 0x117   : > { %v3904_v24 = vpop.f32.mrb[1].mxu0 }
 0x118   : > { %v3938_v25 = vpop.f32.mrb[0].mxu1  ;;  %v3905_v26 = vadd.f32 %v3904_v24, %v3903_v22 }
 0x119   : > { %v3939_v27 = vpop.f32.mrb[1].mxu1 }
 0x11a   : > { %v3940_v28 = vadd.f32 %v3939_v27, %v3938_v25  ;;  %v830_v29 = vadd.f32 %v3905_v26, %v3769_v23 }
 0x11c   : > { %v900_v30 = vadd.f32 %v3940_v28, %v830_v29 }
 0x136   : > { %v3973_v33 = vpop.f32.mrb[2].mxu0 }
 0x137   : > { %v3974_v34 = vpop.f32.mrb[3].mxu0 }
 0x138   : > { %v3975_v35 = vadd.f32 %v3974_v34, %v3973_v33 }
 0x13a   : > { %v970_v37 = vadd.f32 %v3975_v35, %v900_v30 }
 0x13c   : > { %v983_v39 = vsel %vm975_vm0, %v3770_v36, %v970_v37 }
 0x13d   : > { %v5154_v40 = vadd.f32 %v984_v38, %v983_v39 }
 0x13f   : > { %v989_v41 = vsel %vm988_vm1, %v5154_v40, 0.0 }
 0x140   : > { %990 = vadd.xlane.f32.xlu0 %v989_v41 }
 0x1cd   : > { %v991_v42 = vpop.xlane.xlu0 %990 }
 0x1ce   : > { %v993_v43 = vmul.f32 0.03125, %v991_v42 }
 0x1d0   : > { %v994_v44 = vsub.f32 %v5154_v40, %v993_v43 }
 0x1d2   : > { %v995_v45 = vmul.f32 %v994_v44, %v994_v44 }
 0x1d4   : > { %v996_v46 = vsel %vm988_vm1, %v995_v45, 0.0  ;;  %v1104_v45 = vld [vmem:[%s5698_s9 + $0x8] sm:$0xff] }
 0x1d5   : > { %997 = vadd.xlane.f32.xlu0 %v996_v46 }
 0x262   : > { %v998_v55 = vpop.xlane.xlu0 %997 }
 0x263   : > { %v999_v56 = vmul.f32 0.03125, %v998_v55 }
 0x265   : > { %v1000_v57 = vadd.f32 1e-06, %v999_v56 }
 0x267   : > { %4556 = vrsqrt.f32 %v1000_v57  ;;  %v1105_v57 = vld [vmem:[%s5698_s9 + $0x10] sm:$0xff] }
 0x271   : > { %v4557_v58 = vpop.eup %4556 }
 0x272   : > { %v1002_v60 = vmul.f32 %v4557_v58, %v994_v44 }
 0x274   : > { %v1009_v62 = vmul.f32 %v3771_v59, %v1002_v60 }
 0x276   : > { %v1016_v63 = vadd.f32 %v3772_v61, %v1009_v62 }
 0x278   : > { %4092 = vmatmul.mubr.msk.f32.vlgmr.msra.gmra.mrb[4].mxu0 %vm1028_vm3, %v1016_v63 }
 0x279   : > { %4126 = vmatprep.mubr.msk.f32.mxu0 %vm4667_vm2, %v4668_v54 }
 0x34b   : > { %v1098_v1 = vpop.f32.mrb[4].mxu0 }
 0x34c   : > { %v5192_v2 = vadd.f32 %v3773_v0, %v1098_v1  ;;  %v4093_v3 = vpop.f32.mrb[5].mxu0 }
 0x34e   : > { %1198 = vrot.lane.b32.xlu0 %v5192_v2, %s4669_s23  ;;  %1108 = vrot.lane.b32.xlu1 %v5192_v2, %s4670_s26  ;;  %v1102_v5 = vmul.f32 0.35355338, %v5192_v2 }
 0x352   : > { %1279 = vrot.lane.b32.xlu0 %v5192_v2, %s5727_s21  ;;  %s5757_s21 = smov 104  }
 0x3c0   : > { %v1109_v4 = vpop.permute.xlu1 %1108  ;;  %v1199_v6 = vpop.permute.xlu0 %1198 }
 0x3c1   : > { %4095 = vmatpush3.xpose.msk.msra.mxu1 %vm1110_vm4, %v1109_v4 }
 0x3c2   : > { %4099 = vmatprep.subr.mxu1 %v4668_v54 }
 0x3c4   : > { %4097 = vmatmul.mubr.msk.f32.vlgmr.msra.gmra.mrb[2].mxu1 %vm1110_vm4, %v1102_v5  ;;  %v1280_v16 = vpop.permute.xlu0 %1279 }
 0x3c5   : > { %4100 = vmatpush3.msk.msra.mxu1 %vm1204_vm5, %v1199_v6  ;;  %4101 = vmatprep.mubr.msk.f32.mxu1 %vm4667_vm2, %v4668_v54 }
 0x3c6   : > { %4104 = vmatprep.subr.mxu1 %v4668_v54 }
 0x497   : > { %v1182_v7 = vpop.f32.mrb[2].mxu1 }
 0x498   : > { %v4098_v8 = vpop.f32.mrb[3].mxu1  ;;  %v1187_v9 = vsel %vm1186_vm6, %v1182_v7, -inf }
 0x499   : > { %1188 = vmax.xlane.f32.xlu1 %v1187_v9 }
 0x4aa   : > { %1591 = vrot.lane.b32.xlu1 %v5192_v2, %s5724_s4  ;;  %s5753_s4 = smov 56  }
 0x526   : > { %v1189_v10 = vpop.xlane.xlu1 %1188 }
 0x527   : > { %v1190_v11 = vsub.f32 %v1182_v7, %v1189_v10 }
 0x529   : > { %v1191_v12 = vmul.f32 1.442695, %v1190_v11  ;;  %v1106_v11 = vld [vmem:[%s5698_s9 + $0x18] sm:$0xff] }
 0x52a   : > { %v1592_v13 = vpop.permute.xlu1 %1591 }
 0x52b   : > { %4558 = vpow2.f32 %v1191_v12  ;;  %4125 = vmatpush3.xpose.msk.msra.mxu0 %vm1110_vm4, %v1592_v13 }
 0x52c   : > { %4134 = vmatprep.subr.mxu0 %v4668_v54 }
 0x535   : > { %v4559_v14 = vpop.eup %4558 }
 0x536   : > { %v1193_v15 = vsel %vm1186_vm6, %v4559_v14, 0.0 }
 0x537   : > { %1194 = vadd.xlane.f32.xlu0 %v1193_v15 }
 0x54d   : > { %1277 = vrot.lane.b32.xlu0 %v1102_v5, %s5728_s28  ;;  %s5758_s28 = smov 72  }
 0x551   : > { %1589 = vrot.lane.b32.xlu0 %v1102_v5, %s5725_s1  ;;  %s5754_s1 = smov 112  }
 0x5c4   : > { %v1195_v17 = vpop.xlane.xlu0 %1194 }
 0x5c5   : > { %4560 = vrcp.f32 %v1195_v17 }
 0x5c8   : > { %v1278_v18 = vpop.permute.xlu0 %1277 }
 0x5cc   : > { %v1590_v19 = vpop.permute.xlu0 %1589 }
 0x5cd   : > { %4127 = vmatmul.mubr.msk.f32.vlgmr.msra.gmra.mrb[6].mxu0 %vm1110_vm4, %v1590_v19 }
 0x5ce   : > { %4136 = vmatprep.mubr.msk.f32.mxu0 %vm4667_vm2, %v4668_v54  ;;  %4135 = vmatpush3.msra.mxu0 %v1105_v57  ;;  %v2202_v57 = vld [vmem:[%s5704_s15 + $0x30] sm:$0xff] }
 0x5cf   : > { %v4561_v20 = vpop.eup %4560  ;;  %4144 = vmatprep.subr.mxu0 %v4668_v54 }
 0x5d0   : > { %v1197_v21 = vmul.f32 %v4561_v20, %v4559_v14 }
 0x5d2   : > { %4102 = vmatmul.mubr.msk.f32.vlgmr.msra.gmra.mrb[4].mxu1 %vm1200_vm7, %v1197_v21 }
 0x5d3   : > { %4105 = vmatpush3.xpose.msk.msra.mxu1 %vm1110_vm4, %v1280_v16  ;;  %4106 = vmatprep.mubr.msk.f32.mxu1 %vm4667_vm2, %v4668_v54 }
 0x5d4   : > { %4109 = vmatprep.subr.mxu1 %v4668_v54 }
 0x5d6   : > { %4107 = vmatmul.mubr.msk.f32.vlgmr.msra.gmra.mrb[6].mxu1 %vm1110_vm4, %v1278_v18 }
 0x5d7   : > { %4111 = vmatprep.mubr.msk.f32.mxu1 %vm4667_vm2, %v4668_v54 }
 0x6a0   : > { %v1663_v22 = vpop.f32.mrb[6].mxu0 }
 0x6a1   : > { %v4128_v23 = vpop.f32.mrb[7].mxu0  ;;  %v1667_v35 = vsel %vm1186_vm6, %v1663_v22, -inf }
 0x6a5   : > { %v1273_v24 = vpop.f32.mrb[4].mxu1 }
 0x6a6   : > { %v4103_v25 = vpop.f32.mrb[5].mxu1 }
 0x6a9   : > { %v1351_v26 = vpop.f32.mrb[6].mxu1 }
 0x6aa   : > { %v4108_v27 = vpop.f32.mrb[7].mxu1  ;;  %v1355_v28 = vsel %vm1186_vm6, %v1351_v26, -inf }
 0x6ab   : > { %1356 = vmax.xlane.f32.xlu0 %v1355_v28 }
 0x6c1   : > { %1366 = vrot.lane.b32.xlu0 %v5192_v2, %s5726_s29  ;;  %s5755_s29 = smov 80  }
 0x6c5   : > { %1678 = vrot.lane.b32.xlu0 %v5192_v2, %s5721_s2  ;;  %s5756_s2 = smov 48  }
 0x6c9   : > { %1829 = vrot.lane.b32.xlu0 %v1102_v5, %s5720_s30  ;;  %s5759_s30 = smov 40  }
 0x738   : > { %v1357_v29 = vpop.xlane.xlu0 %1356 }
 0x739   : > { %v1358_v30 = vsub.f32 %v1351_v26, %v1357_v29 }
 0x73b   : > { %v1359_v31 = vmul.f32 1.442695, %v1358_v30 }
 0x73c   : > { %v1367_v32 = vpop.permute.xlu0 %1366 }
 0x73d   : > { %4562 = vpow2.f32 %v1359_v31  ;;  %4110 = vmatpush3.msk.msra.mxu1 %vm1204_vm5, %v1367_v32  ;;  %v2107_v31 = vld [vmem:[%s5702_s13] sm:$0xff] }
 0x73e   : > { %4114 = vmatprep.subr.mxu1 %v4668_v54 }
 0x740   : > { %v1679_v52 = vpop.permute.xlu0 %1678 }
 0x744   : > { %v1830_v56 = vpop.permute.xlu0 %1829 }
 0x747   : > { %v4563_v33 = vpop.eup %4562 }
 0x748   : > { %v1361_v34 = vsel %vm1186_vm6, %v4563_v33, 0.0 }
 0x749   : > { %1362 = vadd.xlane.f32.xlu1 %v1361_v34  ;;  %v2110_v34 = vld [vmem:[%s5702_s13 + $0x18] sm:$0xff] }
 0x74d   : > { %1668 = vmax.xlane.f32.xlu1 %v1667_v35 }
 0x7d6   : > { %v1363_v36 = vpop.xlane.xlu1 %1362 }
 0x7d7   : > { %4564 = vrcp.f32 %v1363_v36  ;;  %v2196_v36 = vld [vmem:[%s5704_s15] sm:$0xff] }
 0x7da   : > { %v1669_v37 = vpop.xlane.xlu1 %1668 }
 0x7db   : > { %v1670_v38 = vsub.f32 %v1663_v22, %v1669_v37  ;;  %v3795_v22 = vld [vmem:[%s5699_s10] ss:$0 sm:$0xff]  ;;  %v2197_v37 = vld [vmem:[%s5704_s15 + $0x8] sm:$0xff] }
 0x7dd   : > { %v1671_v39 = vmul.f32 1.442695, %v1670_v38  ;;  %v2198_v38 = vld [vmem:[%s5704_s15 + $0x10] sm:$0xff] }
 0x7df   : > { %4566 = vpow2.f32 %v1671_v39  ;;  %v4437_v39 = vpack.c.bf16 %v2197_v37, %v2196_v36  ;;  %v3803_v37 = vld [vmem:[%s5750_s22 + $0x1] ss:$0 sm:$0xff] }
 0x7e1   : > { %v4565_v41 = vpop.eup %4564 }
 0x7e2   : > { %v1365_v42 = vmul.f32 %v4565_v41, %v4563_v33  ;;  %v2109_v33 = vld [vmem:[%s5702_s13 + $0x10] sm:$0xff]  ;;  %v2199_v41 = vld [vmem:[%s5704_s15 + $0x18] sm:$0xff] }
 0x7e3   : > { %v4434_v35 = vpack.c.bf16 %v2110_v34, %v2109_v33 }
 0x7e4   : > { %4112 = vmatmul.mubr.msk.f32.vlgmr.msra.gmra.mrb[8].mxu1 %vm1200_vm7, %v1365_v42  ;;  %v4440_v42 = vpack.c.bf16 %v2199_v41, %v2198_v38 }
 0x7e5   : > { %4116 = vmatprep.mubr.msk.f32.mxu1 %vm4667_vm2, %v4668_v54  ;;  %4115 = vmatpush3.msra.mxu1 %v1104_v45 }
 0x7e6   : > { %4119 = vmatprep.subr.mxu1 %v4668_v54 }
 0x7e9   : > { %v4567_v43 = vpop.eup %4566 }
 0x7ea   : > { %v1673_v44 = vsel %vm1186_vm6, %v4567_v43, 0.0 }
 0x7eb   : > { %1674 = vadd.xlane.f32.xlu1 %v1673_v44  ;;  %v2201_v44 = vld [vmem:[%s5704_s15 + $0x28] sm:$0xff] }
 0x7fc   : > { %1831 = vrot.lane.b32.xlu1 %v5192_v2, %s5723_s27  ;;  %s647_s27 = sand.u32 1, %s4656_s25  }
 0x878   : > { %v1675_v46 = vpop.xlane.xlu1 %1674 }
 0x879   : > { %4568 = vrcp.f32 %v1675_v46 }
 0x87c   : > { %v1832_v55 = vpop.permute.xlu1 %1831 }
 0x883   : > { %v4569_v51 = vpop.eup %4568 }
 0x884   : > { %v1677_v53 = vmul.f32 %v4569_v51, %v4567_v43  ;;  %v2200_v43 = vld [vmem:[%s5704_s15 + $0x20] sm:$0xff] }
 0x885   : > { %v4443_v45 = vpack.c.bf16 %v2201_v44, %v2200_v43  ;;  %v3796_v51 = vld [vmem:[%s5700_s11] ss:$0 sm:$0xff]  ;;  %v3810_v43 = vld [vmem:[%s5697_s8 + $0x1] ss:$0 sm:$0xff] }
 0x8b7   : > { %v1439_v48 = vpop.f32.mrb[8].mxu1 }
 0x8b8   : > { %v4113_v49 = vpop.f32.mrb[9].mxu1  ;;  %4117 = vmatmul.mubr.msk.f32.vlgmr.msra.gmra.mrb[10].mxu1 %vm1110_vm4, %v1439_v48 }
 0x8b9   : > { %4120 = vmatpush3.msra.mxu1 %v1103_v47  ;;  %4121 = vmatprep.mubr.msk.f32.mxu1 %vm4667_vm2, %v4668_v54 }
 0x8ba   : > { %4129 = vmatprep.subr.mxu1 %v4668_v54 }
 0x8bc   : > { %4122 = vmatmul.mubr.msk.f32.vlgmr.msra.gmra.mrb[12].mxu1 %vm1110_vm4, %v1273_v24 }
 0x8bd   : > { %4130 = vmatpush3.msk.msra.mxu1 %vm1204_vm5, %v1679_v52  ;;  %4131 = vmatprep.mubr.msk.f32.mxu1 %vm4667_vm2, %v4668_v54 }
 0x8be   : > { %4139 = vmatprep.subr.mxu1 %v4668_v54 }
 0x8c0   : > { %4132 = vmatmul.mubr.msk.f32.vlgmr.msra.gmra.mrb[14].mxu1 %vm1200_vm7, %v1677_v53  ;;  %v3797_v53 = vld [vmem:[%s5701_s12] ss:$0 sm:$0xff] }
 0x8c1   : > { %4141 = vmatprep.mubr.msk.f32.mxu1 %vm4667_vm2, %v4668_v54 }
 0x8c4   : > { %4140 = vmatpush3.xpose.msk.msra.mxu1 %vm1110_vm4, %v1832_v55 }
 0x8c5   : > { %4149 = vmatprep.subr.mxu1 %v4668_v54 }
 0x8c7   : > { %4142 = vmatmul.mubr.msk.f32.vlgmr.msra.gmra.mrb[16].mxu1 %vm1110_vm4, %v1830_v56 }
 0x8c8   : > { %4151 = vmatprep.mubr.msk.f32.mxu1 %vm4667_vm2, %v4668_v54  ;;  %4150 = vmatpush3.msra.mxu1 %v1106_v11 }
 0x8c9   : > { %4436 = vmatprep.subr.bf16.mxu1 %v4666_v50 }
 0x98b   : > { %v1512_v58 = vpop.f32.mrb[10].mxu1 }
 0x98c   : > { %v4118_v59 = vpop.f32.mrb[11].mxu1 }
 0x98f   : > { %v1585_v60 = vpop.f32.mrb[12].mxu1 }
 0x990   : > { %v1586_v61 = vadd.f32 %v1585_v60, %v1512_v58  ;;  %v4123_v62 = vpop.f32.mrb[13].mxu1  ;;  %v2203_v58 = vld [vmem:[%s5704_s15 + $0x38] sm:$0xff]  ;;  %v2204_v60 = vld [vmem:[%s5704_s15 + $0x40] sm:$0xff] }
 0x991   : > { %v4446_v59 = vpack.c.bf16 %v2203_v58, %v2202_v57 }
 0x993   : > { %v1751_v63 = vpop.f32.mrb[14].mxu1 }
 0x994   : > { %v4133_v0 = vpop.f32.mrb[15].mxu1  ;;  %4137 = vmatmul.mubr.msk.f32.vlgmr.msra.gmra.mrb[8].mxu0 %vm1110_vm4, %v1751_v63  ;;  %v2206_v63 = vld [vmem:[%s5704_s15 + $0x50] sm:$0xff] }
 0x995   : > { %4146 = vmatprep.mubr.msk.f32.mxu0 %vm4667_vm2, %v4668_v54  ;;  %v2207_v0 = vld [vmem:[%s5704_s15 + $0x58] sm:$0xff] }
 0x99a   : > { %v1903_v1 = vpop.f32.mrb[16].mxu1 }
 0x99b   : > { %v4143_v3 = vpop.f32.mrb[17].mxu1  ;;  %v1907_v4 = vsel %vm1186_vm6, %v1903_v1, -inf }
 0x99c   : > { %1908 = vmax.xlane.f32.xlu0 %v1907_v4  ;;  %v2208_v3 = vld [vmem:[%s5704_s15 + $0x60] sm:$0xff]  ;;  %v2209_v4 = vld [vmem:[%s5704_s15 + $0x68] sm:$0xff] }
 0x9b2   : > { %1918 = vrot.lane.b32.xlu0 %v5192_v2, %s5722_s20 }
 0xa29   : > { %v1909_v5 = vpop.xlane.xlu0 %1908 }
 0xa2a   : > { %v1910_v6 = vsub.f32 %v1903_v1, %v1909_v5  ;;  %v4452_v1 = vpack.c.bf16 %v2207_v0, %v2206_v63  ;;  %v4455_v5 = vpack.c.bf16 %v2209_v4, %v2208_v3 }
 0xa2c   : > { %v1911_v7 = vmul.f32 1.442695, %v1910_v6  ;;  %v2210_v6 = vld [vmem:[%s5704_s15 + $0x70] sm:$0xff] }
 0xa2d   : > { %v1919_v8 = vpop.permute.xlu0 %1918 }
 0xa2e   : > { %4570 = vpow2.f32 %v1911_v7  ;;  %4145 = vmatpush3.msk.msra.mxu0 %vm1204_vm5, %v1919_v8  ;;  %v2211_v7 = vld [vmem:[%s5704_s15 + $0x78] sm:$0xff] }
 0xa2f   : > { %4430 = vmatprep.subr.bf16.mxu0 %v4666_v50  ;;  %v4458_v8 = vpack.c.bf16 %v2211_v7, %v2210_v6 }
 0xa38   : > { %v4571_v9 = vpop.eup %4570 }
 0xa39   : > { %v1913_v10 = vsel %vm1186_vm6, %v4571_v9, 0.0 }
 0xa3a   : > { %1914 = vadd.xlane.f32.xlu1 %v1913_v10 }
 0xa67   : > { %v1824_v2 = vpop.f32.mrb[8].mxu0 }
 0xa68   : > { %v1828_v12 = vadd.f32 %v1824_v2, %v1586_v61  ;;  %v4138_v13 = vpop.f32.mrb[9].mxu0  ;;  %v2205_v61 = vld [vmem:[%s5704_s15 + $0x48] sm:$0xff] }
 0xa69   : > { %v4449_v62 = vpack.c.bf16 %v2205_v61, %v2204_v60 }
 0xac7   : > { %v1915_v14 = vpop.xlane.xlu1 %1914 }
 0xac8   : > { %4572 = vrcp.f32 %v1915_v14 }
 0xad2   : > { %v4573_v15 = vpop.eup %4572 }
 0xad3   : > { %v1917_v16 = vmul.f32 %v4573_v15, %v4571_v9  ;;  %v3798_v9 = vld [vmem:[%s5703_s14] ss:$0 sm:$0xff] }
 0xad5   : > { %4147 = vmatmul.mubr.msk.f32.vlgmr.msra.gmra.mrb[10].mxu0 %vm1200_vm7, %v1917_v16 }
 0xad6   : > { %4162 = vmatprep.mubr.msk.f32.mxu0 %vm4667_vm2, %v4668_v54 }
 0xba8   : > { %v1991_v17 = vpop.f32.mrb[10].mxu0 }
 0xba9   : > { %v4148_v18 = vpop.f32.mrb[11].mxu0  ;;  %4152 = vmatmul.mubr.msk.f32.vlgmr.msra.gmra.mrb[18].mxu1 %vm1110_vm4, %v1991_v17  ;;  %v3800_v17 = vld [vmem:[%s5705_s16] ss:$0 sm:$0xff] }
 0xbaa   : > { %4197 = vmatprep.mubr.msk.f32.mxu1 %vm4667_vm2, %v4668_v54  ;;  %4438 = vmatpush3.bf16.msra.mxu1 %v4437_v39  ;;  %v3804_v39 = vld [vmem:[%s5695_s6 + $0x1] ss:$0 sm:$0xff] }
 0xbab   : > { %4439 = vmatprep.subr.bf16.mxu1 %v4666_v50 }
 0xbae   : > { %4441 = vmatpush3.bf16.msra.mxu1 %v4440_v42 }
 0xbaf   : > { %4442 = vmatprep.subr.bf16.mxu1 %v4666_v50 }
 0xbb2   : > { %4444 = vmatpush3.bf16.msra.mxu1 %v4443_v45 }
 0xbb3   : > { %4445 = vmatprep.subr.bf16.mxu1 %v4666_v50 }
 0xbb6   : > { %4447 = vmatpush3.bf16.msra.mxu1 %v4446_v59 }
 0xbb7   : > { %4448 = vmatprep.subr.bf16.mxu1 %v4666_v50 }
 0xbba   : > { %4450 = vmatpush3.bf16.msra.mxu1 %v4449_v62 }
 0xbbb   : > { %4451 = vmatprep.subr.bf16.mxu1 %v4666_v50 }
 0xbbe   : > { %4453 = vmatpush3.bf16.msra.mxu1 %v4452_v1  ;;  %v3812_v1 = vld [vmem:[%s5698_s9 + $0x20] sm:$0xff] }
 0xbbf   : > { %4454 = vmatprep.subr.bf16.mxu1 %v4666_v50 }
 0xbc2   : > { %4456 = vmatpush3.bf16.msra.mxu1 %v4455_v5 }
 0xbc3   : > { %4457 = vmatprep.subr.bf16.mxu1 %v4666_v50 }
 0xbc6   : > { %4459 = vmatpush3.bf16.msra.mxu1 %v4458_v8 }
 0xbc7   : > { %4236 = vmatprep.subr.mxu1 %v4668_v54 }
 0xc7c   : > { %v2064_v19 = vpop.f32.mrb[18].mxu1 }
 0xc7d   : > { %v2068_v20 = vadd.f32 %v2064_v19, %v1828_v12  ;;  %v4153_v21 = vpop.f32.mrb[19].mxu1 }
 0xc7f   : > { %v2069_v23 = vadd.f32 %v2068_v20, %v5154_v40  ;;  %v2108_v40 = vld [vmem:[%s5702_s13 + $0x8] sm:$0xff] }
 0xc80   : > { %v4431_v32 = vpack.c.bf16 %v2108_v40, %v2107_v31  ;;  %v3807_v31 = vld [vmem:[%s5696_s7 + $0x30] sm:$0xff]  ;;  %v3808_v40 = vld [vmem:[%s5696_s7 + $0x38] sm:$0xff] }
 0xc81   : > { %v5294_v24 = vadd.f32 %v3795_v22, %v2069_v23 }
 0xc82   : > { %4432 = vmatpush3.bf16.msra.mxu0 %v4431_v32  ;;  %v4464_v32 = vpack.c.bf16 %v3808_v40, %v3807_v31 }
 0xc83   : > { %v2080_v25 = vsel %vm988_vm1, %v5294_v24, 0.0  ;;  %4433 = vmatprep.subr.bf16.mxu0 %v4666_v50 }
 0xc84   : > { %2081 = vadd.xlane.f32.xlu1 %v2080_v25 }
 0xc86   : > { %4435 = vmatpush3.bf16.msra.mxu0 %v4434_v35 }
 0xc87   : > { %4460 = vmatprep.subr.bf16.mxu0 %v4666_v50 }
 0xd11   : > { %v2082_v26 = vpop.xlane.xlu1 %2081 }
 0xd12   : > { %v2083_v27 = vmul.f32 0.03125, %v2082_v26 }
 0xd14   : > { %v2084_v28 = vsub.f32 %v5294_v24, %v2083_v27 }
 0xd16   : > { %v2085_v29 = vmul.f32 %v2084_v28, %v2084_v28 }
 0xd18   : > { %v2086_v30 = vsel %vm988_vm1, %v2085_v29, 0.0  ;;  %v3805_v29 = vld [vmem:[%s5696_s7 + $0x20] sm:$0xff] }
 0xd19   : > { %2087 = vadd.xlane.f32.xlu1 %v2086_v30 }
 0xda6   : > { %v2088_v46 = vpop.xlane.xlu1 %2087 }
 0xda7   : > { %v2089_v47 = vmul.f32 0.03125, %v2088_v46 }
 0xda9   : > { %v2090_v48 = vadd.f32 1e-06, %v2089_v47 }
 0xdab   : > { %4574 = vrsqrt.f32 %v2090_v48 }
 0xdb5   : > { %v4575_v49 = vpop.eup %4574 }
 0xdb6   : > { %v2092_v52 = vmul.f32 %v4575_v49, %v2084_v28 }
 0xdb8   : > { %v2099_v55 = vmul.f32 %v3796_v51, %v2092_v52 }
 0xdba   : > { %v2106_v56 = vadd.f32 %v3797_v53, %v2099_v55 }
 0xdbc   : > { %4163 = vmatmul.mubr.msk.f32.vlgmr.msra.gmra.mrb[12].mxu0 %vm1028_vm3, %v2106_v56 }
 0xdbd   : > { %4208 = vmatprep.mubr.msk.f32.mxu0 %vm4667_vm2, %v4668_v54 }
 0xe8f   : > { %v2187_v10 = vpop.f32.mrb[12].mxu0 }
 0xe90   : > { %v2188_v11 = vadd.f32 %v3798_v9, %v2187_v10  ;;  %v4164_v2 = vpop.f32.mrb[13].mxu0 }
 0xe92   : > { %v2192_v12 = vmul.f32 0.70710677, %v2188_v11  ;;  %v2191_v14 = vmul.f32 0.5, %v2188_v11 }
 0xe94   : > { %4576 = verf.f32 %v2192_v12 }
 0xe9e   : > { %v4577_v13 = vpop.eup %4576 }
 0xe9f   : > { %v2194_v15 = vadd.f32 1.0, %v4577_v13 }
 0xea1   : > { %v2195_v16 = vmul.f32 %v2194_v15, %v2191_v14 }
 0xea3   : > { %4198 = vmatmul.mubr.f32.vlgmr.msra.gmra.mrb[20].mxu1 %v2195_v16 }
 0xea4   : > { %4238 = vmatprep.mubr.msk.f32.mxu1 %vm4667_vm2, %v4668_v54  ;;  %4237 = vmatpush3.msra.mxu1 %v3812_v1 }
 0xea5   : > { %4246 = vmatprep.subr.mxu1 %v4668_v54 }
 0xf76   : > { %v2285_v18 = vpop.f32.mrb[20].mxu1 }
 0xf77   : > { %v2286_v19 = vadd.f32 %v3800_v17, %v2285_v18  ;;  %v4199_v20 = vpop.f32.mrb[21].mxu1  ;;  %v3813_v18 = vld [vmem:[%s5698_s9 + $0x28] sm:$0xff] }
 0xf79   : > { %v5388_v21 = vadd.f32 %v2286_v19, %v5294_v24  ;;  %v3806_v24 = vld [vmem:[%s5696_s7 + $0x28] sm:$0xff] }
 0xf7a   : > { %v4461_v30 = vpack.c.bf16 %v3806_v24, %v3805_v29 }
 0xf7b   : > { %v2294_v22 = vsel %vm988_vm1, %v5388_v21, 0.0 }
 0xf7c   : > { %2295 = vadd.xlane.f32.xlu0 %v2294_v22  ;;  %4462 = vmatpush3.bf16.msra.mxu0 %v4461_v30 }
 0xf7d   : > { %4463 = vmatprep.subr.bf16.mxu0 %v4666_v50 }
 0xf80   : > { %4465 = vmatpush3.bf16.msra.mxu0 %v4464_v32 }
 0xf81   : > { %4211 = vmatprep.subr.mxu0 %v4668_v54 }
0x1009   : > { %v2296_v23 = vpop.xlane.xlu0 %2295 }
0x100a   : > { %v2297_v25 = vmul.f32 0.03125, %v2296_v23 }
0x100c   : > { %v2298_v26 = vsub.f32 %v5388_v21, %v2297_v25 }
0x100e   : > { %v2299_v27 = vmul.f32 %v2298_v26, %v2298_v26 }
0x1010   : > { %v2300_v28 = vsel %vm988_vm1, %v2299_v27, 0.0 }
0x1011   : > { %2301 = vadd.xlane.f32.xlu1 %v2300_v28 }
0x109e   : > { %v2302_v33 = vpop.xlane.xlu1 %2301 }
0x109f   : > { %v2303_v34 = vmul.f32 0.03125, %v2302_v33 }
0x10a1   : > { %v2304_v35 = vadd.f32 1e-06, %v2303_v34 }
0x10a3   : > { %4578 = vrsqrt.f32 %v2304_v35 }
0x10ad   : > { %v4579_v36 = vpop.eup %4578 }
0x10ae   : > { %v2306_v38 = vmul.f32 %v4579_v36, %v2298_v26 }
0x10b0   : > { %v2313_v41 = vmul.f32 %v3803_v37, %v2306_v38 }
0x10b2   : > { %v2320_v42 = vadd.f32 %v3804_v39, %v2313_v41  ;;  %v3814_v41 = vld [vmem:[%s5698_s9 + $0x30] sm:$0xff] }
0x10b4   : > { %4209 = vmatmul.mubr.msk.f32.vlgmr.msra.gmra.mrb[14].mxu0 %vm1028_vm3, %v2320_v42 }
0x10b5   : > { %4213 = vmatprep.mubr.msk.f32.mxu0 %vm4667_vm2, %v4668_v54 }
0x1187   : > { %v2403_v44 = vpop.f32.mrb[14].mxu0 }
0x1188   : > { %v5420_v45 = vadd.f32 %v3810_v43, %v2403_v44  ;;  %v4210_v46 = vpop.f32.mrb[15].mxu0 }
0x118a   : > { %2502 = vrot.lane.b32.xlu0 %v5420_v45, %s4669_s23  ;;  %2414 = vrot.lane.b32.xlu1 %v5420_v45, %s4670_s26  ;;  %v5428_v48 = vmul.f32 0.35355338, %v5420_v45  ;;  %s5751_s23 = smov 120   ;;  %s5752_s26 = smov 88  }
0x11fc   : > { %v2415_v47 = vpop.permute.xlu1 %2414  ;;  %v2503_v49 = vpop.permute.xlu0 %2502 }
0x11fd   : > { %4212 = vmatpush3.xpose.msk.msra.mxu0 %vm1110_vm4, %v2415_v47 }
0x11fe   : > { %4216 = vmatprep.subr.mxu0 %v4668_v54 }
0x1200   : > { %4214 = vmatmul.mubr.msk.f32.vlgmr.msra.gmra.mrb[16].mxu0 %vm1110_vm4, %v5428_v48 }
0x1201   : > { %4217 = vmatpush3.msk.msra.mxu0 %vm1204_vm5, %v2503_v49  ;;  %4218 = vmatprep.mubr.msk.f32.mxu0 %vm4667_vm2, %v4668_v54 }
0x1202   : > { %4221 = vmatprep.subr.mxu0 %v4668_v54 }
0x12d3   : > { %v2487_v51 = vpop.f32.mrb[16].mxu0 }
0x12d4   : > { %v4215_v52 = vpop.f32.mrb[17].mxu0  ;;  %v2491_v53 = vsel %vm1186_vm6, %v2487_v51, -inf }
0x12d5   : > { %2492 = vmax.xlane.f32.xlu1 %v2491_v53 }
0x12e6   : > { %2579 = vrot.lane.b32.xlu1 %v5428_v48, %s5751_s23  ;;  %s648_s23 = scalar_lea.vmem [#allocation2], %s647_s27 }
0x1362   : > { %v2493_v55 = vpop.xlane.xlu1 %2492 }
0x1363   : > { %v2494_v56 = vsub.f32 %v2487_v51, %v2493_v55 }
0x1365   : > { %v2495_v57 = vmul.f32 1.442695, %v2494_v56  ;;  %v3815_v56 = vld [vmem:[%s5698_s9 + $0x38] sm:$0xff] }
0x1366   : > { %v2580_v0 = vpop.permute.xlu1 %2579 }
0x1367   : > { %4580 = vpow2.f32 %v2495_v57 }
0x1371   : > { %v4581_v58 = vpop.eup %4580 }
0x1372   : > { %v2497_v59 = vsel %vm1186_vm6, %v4581_v58, 0.0 }
0x1373   : > { %2498 = vadd.xlane.f32.xlu0 %v2497_v59 }
0x1389   : > { %2581 = vrot.lane.b32.xlu0 %v5420_v45, %s5752_s26  ;;  %s3709_s26 = sshll.u32 %s648_s23, 4  ;;  %s5649_s26 = int_to_ptr.vmem [resolvable:$true] %s3709_s26 }
0x138a   : > { %s4602_s20 = scalar_lea.vmem %s5649_s26, 16 }
0x138b   : > { %p4603_p11 = scmp.ne.s32.totalorder %s5649_s26, %s4602_s20 }
0x138d   : > { %p4604_p12 = pnand %p4603_p11, %p4829_p5 }
0x138f   : > { %p4605_p13 = pneg %p4604_p12 }
0x1400   : > { %v2499_v60 = vpop.xlane.xlu0 %2498 }
0x1401   : > { %4582 = vrcp.f32 %v2499_v60 }
0x1404   : > { %v2582_v63 = vpop.permute.xlu0 %2581 }
0x140b   : > { %v4583_v61 = vpop.eup %4582 }
0x140c   : > { %v2501_v62 = vmul.f32 %v4583_v61, %v4581_v58 }
0x140e   : > { %4219 = vmatmul.mubr.msk.f32.vlgmr.msra.gmra.mrb[18].mxu0 %vm1200_vm7, %v2501_v62 }
0x140f   : > { %4222 = vmatpush3.xpose.msk.msra.mxu0 %vm1110_vm4, %v2582_v63  ;;  %4223 = vmatprep.mubr.msk.f32.mxu0 %vm4667_vm2, %v4668_v54 }
0x1410   : > { %4226 = vmatprep.subr.mxu0 %v4668_v54 }
0x1412   : > { %4224 = vmatmul.mubr.msk.f32.vlgmr.msra.gmra.mrb[20].mxu0 %vm1110_vm4, %v2580_v0 }
0x1413   : > { %4228 = vmatprep.mubr.msk.f32.mxu0 %vm4667_vm2, %v4668_v54 }
0x14e1   : > { %v2575_v3 = vpop.f32.mrb[18].mxu0 }
0x14e2   : > { %v4220_v4 = vpop.f32.mrb[19].mxu0  ;;  %4239 = vmatmul.mubr.msk.f32.vlgmr.msra.gmra.mrb[22].mxu1 %vm1110_vm4, %v2575_v3 }
0x14e3   : > { %4248 = vmatprep.mubr.msk.f32.mxu1 %vm4667_vm2, %v4668_v54  ;;  %v3837_v4 = vld [vmem:[%s5699_s10 + $0x1] ss:$0 sm:$0xff] }
0x14e5   : > { %v2653_v5 = vpop.f32.mrb[20].mxu0 }
0x14e6   : > { %v4225_v6 = vpop.f32.mrb[21].mxu0  ;;  %v2657_v7 = vsel %vm1186_vm6, %v2653_v5, -inf }
0x14e7   : > { %2658 = vmax.xlane.f32.xlu0 %v2657_v7 }
0x14fd   : > { %2668 = vrot.lane.b32.xlu0 %v5420_v45, %s5753_s4  ;;  %s5761_s4 = sld [smem:[#allocation18_spill]] }
0x1501   : > { %2891 = vrot.lane.b32.xlu0 %v5428_v48, %s5754_s1 }
0x1574   : > { %v2659_v8 = vpop.xlane.xlu0 %2658 }
0x1575   : > { %v2660_v9 = vsub.f32 %v2653_v5, %v2659_v8 }
0x1577   : > { %v2661_v10 = vmul.f32 1.442695, %v2660_v9 }
0x1578   : > { %v2669_v11 = vpop.permute.xlu0 %2668 }
0x1579   : > { %4584 = vpow2.f32 %v2661_v10  ;;  %4227 = vmatpush3.msk.msra.mxu0 %vm1204_vm5, %v2669_v11 }
0x157a   : > { %4231 = vmatprep.subr.mxu0 %v4668_v54 }
0x157c   : > { %v2892_v23 = vpop.permute.xlu0 %2891 }
0x1583   : > { %v4585_v2 = vpop.eup %4584 }
0x1584   : > { %v2663_v12 = vsel %vm1186_vm6, %v4585_v2, 0.0 }
0x1585   : > { %2664 = vadd.xlane.f32.xlu1 %v2663_v12  ;;  %v3842_v12 = vld [vmem:[%s5702_s13 + $0x20] sm:$0xff] }
0x1596   : > { %2893 = vrot.lane.b32.xlu1 %v5420_v45, %s5755_s29  ;;  %s3697_s29 = scalar_lea.sflag [#allocation3], %s647_s27 }
0x15b5   : > { %v2887_v13 = vpop.f32.mrb[22].mxu1 }
0x15b6   : > { %v4240_v14 = vpop.f32.mrb[23].mxu1 }
0x15b7   : > { %v3844_v14 = vld [vmem:[%s5702_s13 + $0x30] sm:$0xff] }
0x1612   : > { %v2665_v15 = vpop.xlane.xlu1 %2664 }
0x1613   : > { %4586 = vrcp.f32 %v2665_v15  ;;  %v3845_v15 = vld [vmem:[%s5702_s13 + $0x38] sm:$0xff] }
0x1616   : > { %v2894_v20 = vpop.permute.xlu1 %2893 }
0x161d   : > { %v4587_v16 = vpop.eup %4586 }
0x161e   : > { %v2667_v17 = vmul.f32 %v4587_v16, %v4585_v2  ;;  %v4470_v16 = vpack.c.bf16 %v3845_v15, %v3844_v14 }
0x1620   : > { %4229 = vmatmul.mubr.msk.f32.vlgmr.msra.gmra.mrb[22].mxu0 %vm1200_vm7, %v2667_v17  ;;  %v3849_v17 = vld [vmem:[%s5704_s15 + $0x80] sm:$0xff] }
0x1621   : > { %4232 = vmatpush3.msra.mxu0 %v3813_v18  ;;  %4233 = vmatprep.mubr.msk.f32.mxu0 %vm4667_vm2, %v4668_v54  ;;  %v3850_v18 = vld [vmem:[%s5704_s15 + $0x88] sm:$0xff] }
0x1622   : > { %4241 = vmatprep.subr.mxu0 %v4668_v54 }
0x16f3   : > { %v2741_v19 = vpop.f32.mrb[22].mxu0 }
0x16f4   : > { %v4230_v22 = vpop.f32.mrb[23].mxu0  ;;  %4234 = vmatmul.mubr.msk.f32.vlgmr.msra.gmra.mrb[24].mxu0 %vm1110_vm4, %v2741_v19  ;;  %v3851_v19 = vld [vmem:[%s5704_s15 + $0x90] sm:$0xff] }
0x16f5   : > { %4242 = vmatpush3.xpose.msk.msra.mxu0 %vm1110_vm4, %v2894_v20  ;;  %4243 = vmatprep.mubr.msk.f32.mxu0 %vm4667_vm2, %v4668_v54  ;;  %v4473_v20 = vpack.c.bf16 %v3850_v18, %v3849_v17  ;;  %v3852_v22 = vld [vmem:[%s5704_s15 + $0x98] sm:$0xff]  ;;  %v3600_v18 = vld [vmem:[%s5707_s18] sm:$0x1] }
0x16f6   : > { %4251 = vmatprep.subr.mxu0 %v4668_v54 }
0x16f8   : > { %4244 = vmatmul.mubr.msk.f32.vlgmr.msra.gmra.mrb[26].mxu0 %vm1110_vm4, %v2892_v23  ;;  %v4476_v23 = vpack.c.bf16 %v3852_v22, %v3851_v19 }
0x16f9   : > { %4253 = vmatprep.mubr.msk.f32.mxu0 %vm4667_vm2, %v4668_v54  ;;  %4252 = vmatpush3.msra.mxu0 %v3814_v41  ;;  %v3859_v41 = vld [vmem:[%s5704_s15 + $0xd0] sm:$0xff] }
0x16fa   : > { %4261 = vmatprep.subr.mxu0 %v4668_v54 }
0x17c7   : > { %v2814_v25 = vpop.f32.mrb[24].mxu0 }
0x17c8   : > { %v2888_v26 = vadd.f32 %v2887_v13, %v2814_v25  ;;  %v4235_v27 = vpop.f32.mrb[25].mxu0  ;;  %v3853_v25 = vld [vmem:[%s5704_s15 + $0xa0] sm:$0xff] }
0x17cb   : > { %v2965_v28 = vpop.f32.mrb[26].mxu0 }
0x17cc   : > { %v4245_v29 = vpop.f32.mrb[27].mxu0  ;;  %v2969_v24 = vsel %vm1186_vm6, %v2965_v28, -inf }
0x17cd   : > { %2970 = vmax.xlane.f32.xlu0 %v2969_v24 }
0x17e3   : > { %2980 = vrot.lane.b32.xlu0 %v5420_v45, %s5756_s2 }
0x17e7   : > { %3131 = vrot.lane.b32.xlu0 %v5428_v48, %s5757_s21  ;;  %s5760_s21 = sld [smem:[#allocation17_spill]] }
0x17ed   : > { %v3621_v22 = vld [vmem:[%s5760_s21] sm:$0x1] }
0x185a   : > { %v2971_v30 = vpop.xlane.xlu0 %2970 }
0x185b   : > { %v2972_v31 = vsub.f32 %v2965_v28, %v2971_v30 }
0x185d   : > { %v2973_v40 = vmul.f32 1.442695, %v2972_v31  ;;  %v3840_v31 = vld [vmem:[%s5700_s11 + $0x1] ss:$0 sm:$0xff] }
0x185e   : > { %v2981_v32 = vpop.permute.xlu0 %2980 }
0x185f   : > { %4588 = vpow2.f32 %v2973_v40  ;;  %4247 = vmatpush3.msk.msra.mxu1 %vm1204_vm5, %v2981_v32  ;;  %v3841_v32 = vld [vmem:[%s5701_s12 + $0x1] ss:$0 sm:$0xff] }
0x1860   : > { %4256 = vmatprep.subr.mxu1 %v4668_v54 }
0x1862   : > { %v3132_v39 = vpop.permute.xlu0 %3131 }
0x1869   : > { %v4589_v33 = vpop.eup %4588 }
0x186a   : > { %v2975_v34 = vsel %vm1186_vm6, %v4589_v33, 0.0 }
0x186b   : > { %2976 = vadd.xlane.f32.xlu1 %v2975_v34 }
0x187c   : > { %3133 = vrot.lane.b32.xlu1 %v5420_v45, %s5758_s28  ;;  %s3868_s28 = sshll.u32 %s4812_s3, 4  ;;  %s4680_s3 = smov [#allocation2]  }
0x187d   : > { %s5647_s1 = scalar_lea.hbm %s5761_s4, %s3868_s28  ;;  %s4606_s2 = sshll.u32 %s4680_s3, 4  ;;  %s4607_s2 = int_to_ptr.vmem [resolvable:$false] %s4606_s2 }
0x187e   : > { %s4608_s21 = scalar_lea.vmem %s4607_s2, 32  ;;  %p4609_p0 = scmp.lt.s32.totalorder %s5649_s26, %s4607_s2 }
0x187f   : > { %p4610_p1 = scmp.lt.s32.totalorder %s4608_s21, %s4602_s20 }
0x1881   : > { %p4611_p2 = por %p4610_p1, %p4609_p0 }
0x1883   : > { %p4612_p3 = pnand %p4611_p2, %p4605_p13 }
0x18f8   : > { %v2977_v35 = vpop.xlane.xlu1 %2976 }
0x18f9   : > { %4590 = vrcp.f32 %v2977_v35  ;;  %v3855_v35 = vld [vmem:[%s5704_s15 + $0xb0] sm:$0xff] }
0x18fc   : > { %v3134_v38 = vpop.permute.xlu1 %3133 }
0x1903   : > { %v4591_v36 = vpop.eup %4590 }
0x1904   : > { %v2979_v37 = vmul.f32 %v4591_v36, %v4589_v33  ;;  %v3856_v36 = vld [vmem:[%s5704_s15 + $0xb8] sm:$0xff] }
0x1906   : > { %4249 = vmatmul.mubr.msk.f32.vlgmr.msra.gmra.mrb[24].mxu1 %vm1200_vm7, %v2979_v37  ;;  %v4482_v37 = vpack.c.bf16 %v3856_v36, %v3855_v35 }
0x1907   : > { %4257 = vmatpush3.xpose.msk.msra.mxu1 %vm1110_vm4, %v3134_v38  ;;  %4258 = vmatprep.mubr.msk.f32.mxu1 %vm4667_vm2, %v4668_v54  ;;  %v3857_v38 = vld [vmem:[%s5704_s15 + $0xc0] sm:$0xff] }
0x1908   : > { %4266 = vmatprep.subr.mxu1 %v4668_v54 }
0x190a   : > { %4259 = vmatmul.mubr.msk.f32.vlgmr.msra.gmra.mrb[26].mxu1 %vm1110_vm4, %v3132_v39 }
0x190b   : > { %4268 = vmatprep.mubr.msk.f32.mxu1 %vm4667_vm2, %v4668_v54  ;;  %4267 = vmatpush3.msra.mxu1 %v3815_v56 }
0x190c   : > { %4472 = vmatprep.subr.bf16.mxu1 %v4666_v50 }
0x19d9   : > { %v3053_v42 = vpop.f32.mrb[24].mxu1 }
0x19da   : > { %v4250_v43 = vpop.f32.mrb[25].mxu1  ;;  %4254 = vmatmul.mubr.msk.f32.vlgmr.msra.gmra.mrb[28].mxu0 %vm1110_vm4, %v3053_v42  ;;  %v3860_v42 = vld [vmem:[%s5704_s15 + $0xd8] sm:$0xff] }
0x19db   : > { %4263 = vmatprep.mubr.msk.f32.mxu0 %vm4667_vm2, %v4668_v54  ;;  %v4488_v43 = vpack.c.bf16 %v3860_v42, %v3859_v41 }
0x19dd   : > { %v3205_v44 = vpop.f32.mrb[26].mxu1 }
0x19de   : > { %v4260_v46 = vpop.f32.mrb[27].mxu1  ;;  %v3209_v47 = vsel %vm1186_vm6, %v3205_v44, -inf }
0x19df   : > { %3210 = vmax.xlane.f32.xlu0 %v3209_v47  ;;  %v3862_v46 = vld [vmem:[%s5704_s15 + $0xe8] sm:$0xff] }
0x19f5   : > { %3220 = vrot.lane.b32.xlu0 %v5420_v45, %s5759_s30 }
0x1a6c   : > { %v3211_v48 = vpop.xlane.xlu0 %3210 }
0x1a6d   : > { %v3212_v49 = vsub.f32 %v3205_v44, %v3211_v48  ;;  %v3861_v44 = vld [vmem:[%s5704_s15 + $0xe0] sm:$0xff]  ;;  %v3863_v48 = vld [vmem:[%s5704_s15 + $0xf0] sm:$0xff] }
0x1a6e   : > { %v4491_v47 = vpack.c.bf16 %v3862_v46, %v3861_v44 }
0x1a6f   : > { %v3213_v51 = vmul.f32 1.442695, %v3212_v49  ;;  %v3864_v49 = vld [vmem:[%s5704_s15 + $0xf8] sm:$0xff] }
0x1a70   : > { %v3221_v52 = vpop.permute.xlu0 %3220 }
0x1a71   : > { %4592 = vpow2.f32 %v3213_v51  ;;  %4262 = vmatpush3.msk.msra.mxu0 %vm1204_vm5, %v3221_v52  ;;  %v4494_v51 = vpack.c.bf16 %v3864_v49, %v3863_v48  ;;  %v3847_v52 = vld [vmem:[%s5703_s14 + $0x1] ss:$0 sm:$0xff] }
0x1a72   : > { %4466 = vmatprep.subr.bf16.mxu0 %v4666_v50 }
0x1a7b   : > { %v4593_v53 = vpop.eup %4592 }
0x1a7c   : > { %v3215_v55 = vsel %vm1186_vm6, %v4593_v53, 0.0 }
0x1a7d   : > { %3216 = vadd.xlane.f32.xlu1 %v3215_v55 }
0x1aad   : > { %v3126_v45 = vpop.f32.mrb[28].mxu0 }
0x1aae   : > { %v3130_v57 = vadd.f32 %v3126_v45, %v2888_v26  ;;  %v4255_v58 = vpop.f32.mrb[29].mxu0  ;;  %v3854_v26 = vld [vmem:[%s5704_s15 + $0xa8] sm:$0xff] }
0x1aaf   : > { %v4479_v27 = vpack.c.bf16 %v3854_v26, %v3853_v25 }
0x1b0a   : > { %v3217_v59 = vpop.xlane.xlu1 %3216 }
0x1b0b   : > { %4594 = vrcp.f32 %v3217_v59 }
0x1b15   : > { %v4595_v60 = vpop.eup %4594 }
0x1b16   : > { %v3219_v61 = vmul.f32 %v4595_v60, %v4593_v53 }
0x1b18   : > { %4264 = vmatmul.mubr.msk.f32.vlgmr.msra.gmra.mrb[30].mxu0 %vm1200_vm7, %v3219_v61  ;;  %v3866_v61 = vld [vmem:[%s5705_s16 + $0x1] ss:$0 sm:$0xff] }
0x1b19   : > { %4279 = vmatprep.mubr.msk.f32.mxu0 %vm4667_vm2, %v4668_v54 }
0x1beb   : > { %v3293_v62 = vpop.f32.mrb[30].mxu0 }
0x1bec   : > { %v4265_v63 = vpop.f32.mrb[31].mxu0  ;;  %4269 = vmatmul.mubr.msk.f32.vlgmr.msra.gmra.mrb[28].mxu1 %vm1110_vm4, %v3293_v62 }
0x1bed   : > { %4314 = vmatprep.mubr.msk.f32.mxu1 %vm4667_vm2, %v4668_v54  ;;  %4474 = vmatpush3.bf16.msra.mxu1 %v4473_v20 }
0x1bee   : > { %4475 = vmatprep.subr.bf16.mxu1 %v4666_v50 }
0x1bf1   : > { %4477 = vmatpush3.bf16.msra.mxu1 %v4476_v23 }
0x1bf2   : > { %4478 = vmatprep.subr.bf16.mxu1 %v4666_v50 }
0x1bf5   : > { %4480 = vmatpush3.bf16.msra.mxu1 %v4479_v27 }
0x1bf6   : > { %4481 = vmatprep.subr.bf16.mxu1 %v4666_v50 }
0x1bf9   : > { %4483 = vmatpush3.bf16.msra.mxu1 %v4482_v37 }
0x1bfa   : > { %4484 = vmatprep.subr.bf16.mxu1 %v4666_v50 }
0x1cbf   : > { %v3366_v0 = vpop.f32.mrb[28].mxu1 }
0x1cc0   : > { %v3370_v1 = vadd.f32 %v3366_v0, %v3130_v57  ;;  %v4270_v3 = vpop.f32.mrb[29].mxu1 }
0x1cc2   : > { %v3371_v5 = vadd.f32 %v3370_v1, %v5388_v21  ;;  %v3843_v21 = vld [vmem:[%s5702_s13 + $0x28] sm:$0xff] }
0x1cc3   : > { %v4467_v13 = vpack.c.bf16 %v3843_v21, %v3842_v12  ;;  %v3620_v12 = vld [vmem:[%s5708_s19 + $0x18] sm:$0xff] }
0x1cc4   : > { %v5528_v6 = vadd.f32 %v3837_v4, %v3371_v5 }
0x1cc5   : > { %4468 = vmatpush3.bf16.msra.mxu0 %v4467_v13 }
0x1cc6   : > { %v3385_v7 = vsel %vm988_vm1, %v5528_v6, 0.0  ;;  %4469 = vmatprep.subr.bf16.mxu0 %v4666_v50 }
0x1cc7   : > { %3386 = vadd.xlane.f32.xlu1 %v3385_v7 }
0x1cc9   : > { %4471 = vmatpush3.bf16.msra.mxu0 %v4470_v16 }
0x1cca   : > { %4496 = vmatprep.subr.bf16.mxu0 %v4666_v50 }
0x1d54   : > { %v3387_v8 = vpop.xlane.xlu1 %3386 }
0x1d55   : > { %v3388_v9 = vmul.f32 0.03125, %v3387_v8 }
0x1d57   : > { %v3389_v10 = vsub.f32 %v5528_v6, %v3388_v9 }
0x1d59   : > { %v3390_v11 = vmul.f32 %v3389_v10, %v3389_v10 }
0x1d5b   : > { %v3391_v2 = vsel %vm988_vm1, %v3390_v11, 0.0  ;;  %v3618_v11 = vld [vmem:[%s5708_s19 + $0x8] sm:$0xff] }
0x1d5c   : > { %3392 = vadd.xlane.f32.xlu1 %v3391_v2 }
0x1de9   : > { %v3393_v28 = vpop.xlane.xlu1 %3392 }
0x1dea   : > { %v3394_v29 = vmul.f32 0.03125, %v3393_v28 }
0x1dec   : > { %v3395_v24 = vadd.f32 1e-06, %v3394_v29 }
0x1dee   : > { %4596 = vrsqrt.f32 %v3395_v24 }
0x1df8   : > { %v4597_v30 = vpop.eup %4596 }
0x1df9   : > { %v3397_v40 = vmul.f32 %v4597_v30, %v3389_v10  ;;  %v3617_v10 = vld [vmem:[%s5708_s19] sm:$0xff] }
0x1dfa   : > { %v4497_v2 = vpack.c.bf16 %v3618_v11, %v3617_v10 }
0x1dfb   : > { %v3404_v33 = vmul.f32 %v3840_v31, %v3397_v40 }
0x1dfd   : > { %v3411_v34 = vadd.f32 %v3841_v32, %v3404_v33 }
0x1dff   : > { %4280 = vmatmul.mubr.msk.f32.vlgmr.msra.gmra.mrb[32].mxu0 %vm1028_vm3, %v3411_v34 }
0x1e00   : > { %4325 = vmatprep.mubr.msk.f32.mxu0 %vm4667_vm2, %v4668_v54  ;;  %v3858_v54 = vld [vmem:[%s5704_s15 + $0xc8] sm:$0xff]  ;;  %4498 = vmatpush3.bf16.msra.mxu0 %v4497_v2 }
0x1e01   : > { %v4485_v39 = vpack.c.bf16 %v3858_v54, %v3857_v38  ;;  %4499 = vmatprep.subr.bf16.mxu0 %v4666_v50 }
0x1e03   : > { %4486 = vmatpush3.bf16.msra.mxu1 %v4485_v39 }
0x1e04   : > { %4487 = vmatprep.subr.bf16.mxu1 %v4666_v50 }
0x1e07   : > { %4489 = vmatpush3.bf16.msra.mxu1 %v4488_v43 }
0x1e08   : > { %4490 = vmatprep.subr.bf16.mxu1 %v4666_v50 }
0x1e0b   : > { %4492 = vmatpush3.bf16.msra.mxu1 %v4491_v47 }
0x1e0c   : > { %4493 = vmatprep.subr.bf16.mxu1 %v4666_v50  ;;  %v3599_v50 = vld [vmem:[%s5706_s17] sm:$0x1] }
0x1e0f   : > { %4495 = vmatpush3.bf16.msra.mxu1 %v4494_v51 }
0x1ed2   : > { %v3494_v53 = vpop.f32.mrb[32].mxu0 }
0x1ed3   : > { %v3495_v55 = vadd.f32 %v3847_v52, %v3494_v53  ;;  %v4281_v56 = vpop.f32.mrb[33].mxu0 }
0x1ed5   : > { %v3499_v45 = vmul.f32 0.70710677, %v3495_v55  ;;  %v3498_v58 = vmul.f32 0.5, %v3495_v55 }
0x1ed7   : > { %4598 = verf.f32 %v3499_v45 }
0x1ee1   : > { %v4599_v57 = vpop.eup %4598 }
0x1ee2   : > { %v3501_v59 = vadd.f32 1.0, %v4599_v57 }
0x1ee4   : > { %v3502_v60 = vmul.f32 %v3501_v59, %v3498_v58 }
0x1ee6   : > { %4315 = vmatmul.mubr.f32.vlgmr.msra.gmra.mrb[30].mxu1 %v3502_v60 }
0x1fb9   : > { %v3594_v62 = vpop.f32.mrb[30].mxu1 }
0x1fba   : > { %v3595_v63 = vadd.f32 %v3866_v61, %v3594_v62  ;;  %v4316_v0 = vpop.f32.mrb[31].mxu1 }
0x1fbc   : > { %v3598_v1 = vadd.f32 %v3595_v63, %v5528_v6  ;;  %v3619_v6 = vld [vmem:[%s5708_s19 + $0x10] sm:$0xff] }
0x1fbd   : > { %v4500_v21 = vpack.c.bf16 %v3620_v12, %v3619_v6 }
0x1fbe   : > { %v3602_v3 = vsel %vm3601_vm8, %v3598_v1, 0.0 }
0x1fbf   : > { %3603 = vadd.xlane.f32.xlu1 %v3602_v3  ;;  %4501 = vmatpush3.bf16.msra.mxu0 %v4500_v21 }
0x204c   : > { %v3604_v4 = vpop.xlane.xlu1 %3603 }
0x204d   : > { %v3605_v5 = vmul.f32 0.03125, %v3604_v4 }
0x204f   : > { %v3606_v7 = vsub.f32 %v3598_v1, %v3605_v5 }
0x2051   : > { %v3607_v8 = vmul.f32 %v3606_v7, %v3606_v7 }
0x2053   : > { %v3608_v9 = vsel %vm3601_vm8, %v3607_v8, 0.0 }
0x2054   : > { %3609 = vadd.xlane.f32.xlu0 %v3608_v9 }
0x20e1   : > { %v3610_v13 = vpop.xlane.xlu0 %3609 }
0x20e2   : > { %v3611_v14 = vmul.f32 0.03125, %v3610_v13 }
0x20e4   : > { %v3612_v15 = vadd.f32 1e-06, %v3611_v14 }
0x20e6   : > { %4600 = vrsqrt.f32 %v3612_v15 }
0x20f0   : > { %v4601_v16 = vpop.eup %4600 }
0x20f1   : > { %v3614_v17 = vmul.f32 %v4601_v16, %v3606_v7 }
0x20f3   : > { %v3615_v19 = vmul.f32 %v3614_v17, %v3599_v50 }
0x20f5   : > { %v3616_v20 = vadd.f32 %v3615_v19, %v3600_v18 }
0x20f7   : > { %4326 = vmatmul.mubr.msk.f32.vlgmr.msra.gmra.mrb[34].mxu0 %vm1028_vm3, %v3616_v20 }
0x21ca   : > { %v3691_v23 = vpop.f32.mrb[34].mxu0 }
0x21cb   : > { %v3692_v25 = vadd.f32 %v3691_v23, %v3621_v22  ;;  %v4327_v26 = vpop.f32.mrb[35].mxu0 }
0x21cd   : > { %3695 = vst [vmem:[%s648_s23] sm:$0x1] %v3692_v25 }
0x21ce   : > { %4615 = shalt.err (!%p4612_p3)
}
0x21cf   : > { %s4616_s27 = scalar_lea.hbm %s5647_s1, 16  ;;  %s4620_s30 = scalar_lea.hbm %s5761_s4, 32 }
0x21d0   : > { %p4617_p4 = scmp.ne.s32.totalorder %s5647_s1, %s4616_s27  ;;  %p4621_p9 = scmp.lt.u32.totalorder %s5647_s1, %s5761_s4 }
0x21d1   : > { %p4622_p10 = scmp.lt.u32.totalorder %s4620_s30, %s4616_s27  ;;  %p4624_p12 = scmp.lt.u32.totalorder %s4616_s27, %s5647_s1 }
0x21d2   : > { %p4618_p7 = pnand %p4617_p4, %p4829_p5 }
0x21d3   : > { %p4623_p11 = por %p4622_p10, %p4621_p9 }
0x21d4   : > { %p4619_p8 = pneg %p4618_p7 }
0x21d5   : > { %p4625_p13 = por %p4624_p12, %p4623_p11 }
0x21d7   : > { %p4626_p0 = pnand %p4625_p13, %p4619_p8 }
0x21d9   : > { %4629 = shalt.err (!%p4626_p0)
}
0x21da   : > { %4503 = dma.vmem_to_hbm [thread:$0]  (%p4829_p5), %s5649_s26, 16, %s5647_s1, %s3697_s29  }
0x21db PF: > { %s5762_s20 = sld [smem:[#allocation7_spill]]  ;;  %s5763_s2 = sld [smem:[#allocation5_spill]] }
0x21e1   : > { %p4509_p1 = scmp.ge.s32.totalorder %s5762_s20, 2  ;;  %s3721_s28 = sand.u32 1, %s5763_s2  }
0x21e2   : > { %s3722_s23 = scalar_lea.sflag [#allocation3], %s3721_s28 }
0x21e3   : > { %p4506_p2 = pnand %p4509_p1, %p4833_p6 }
0x21e5   : > { %4647 = dma.done.wait (!%p4506_p2), %s3722_s23, 16  }
0x21e6   : > { %4649 = vsyncadd (!%p4506_p2), %s3722_s23, 4294967280  ;;  %s5765_s27 = sld [smem:[#allocation8_spill]]  ;;  %s5766_s30 = sld [smem:[#allocation6_spill]] }
0x21e7   : > { %s5767_s26 = sld [smem:[#allocation9_spill]]  ;;  %s5768_s2 = smov %s4656_s25 }
0x21ec   : > { %p31_p3 = scmp.ge.s32.totalorder %s5765_s27, 4   ;;  %s5769_s25 = smov %s5766_s30 }
0x21ee   :  { %33 = sbr.rel (!%p31_p3) target bundleno = 12 (0xc), region = 151 }
0x21f5   :  { %3726 = vsyncpa [#allocation3], 1 }
0x21f6   :  { %3728 = vsyncpa [#allocation3 + $0x1], 1 }

</bundles_post_ra>
